<compile_context>
chip_gen: v6e
topology: v6e:2x2x1
jax: 0.10.0
libtpu: 0.0.40
codegen_flags: <defaults>
</compile_context>

<pallas_src>
import jax
import jax.numpy as jnp
from jax import lax
from jax.experimental import pallas as pl
from jax.experimental.pallas import tpu as pltpu


_WL = 8  # left W-pad of the conv scratches -> sublane-aligned interior stores


# ----------------------------------------------------------------------------
# Kernel
# ----------------------------------------------------------------------------
def down_step_kernel(x_ref, w1_ref, s1_ref, b1_ref, w2_ref, s2_ref, b2_ref,
                     o_ref, pad1_ref, pad2_ref):
    Nb, Hp, _, Wp, lanes = x_ref.shape      # x packed as (Nb, Hp, 2, Wp, 2*Cin)
    Cin = lanes // 2
    Cp = w1_ref.shape[2]                    # lane-padded output channel count
    M = Nb * Hp * Wp
    WT = _WL + Wp + 1                       # scratch width (8-left-pad + 1-right)
    cdt = pad1_ref.dtype                    # matmul-operand dtype (bf16 or f32)

    # ---- zero only the 1-pixel conv border that the taps actually read.
    #      Columns 0.._WL-2 are never read.  Re-done every grid step, so the
    #      kernel stays correct if the "parallel" axis is split across cores.
    def zero_border(pad_ref, C):
        pad_ref[:, 0:1, :, :] = jnp.zeros((Nb, 1, WT, C), cdt)
        pad_ref[:, Hp + 1:Hp + 2, :, :] = jnp.zeros((Nb, 1, WT, C), cdt)
        pad_ref[:, :, _WL - 1:_WL, :] = jnp.zeros((Nb, Hp + 2, 1, C), cdt)
        pad_ref[:, :, _WL + Wp:_WL + Wp + 1, :] = jnp.zeros((Nb, Hp + 2, 1, C), cdt)

    zero_border(pad1_ref, Cin)
    zero_border(pad2_ref, Cp)

    # ---- MaxPool2d(2): host packed (N, Hp, 2, Wp, 2*Cin), so both reductions
    #      are plain static slices (no strided ref loads).  f32 pool math. ----
    xv = x_ref[...]
    m = jnp.maximum(xv[:, :, 0], xv[:, :, 1])             # (Nb, Hp, Wp, 2*Cin)
    pooled = jnp.maximum(m[..., :Cin], m[..., Cin:])      # (Nb, Hp, Wp,   Cin)
    pad1_ref[:, 1:Hp + 1, _WL:_WL + Wp, :] = pooled.astype(cdt)

    # ---- 3x3 conv = 9 shifted-view matmuls accumulated in f32 on the MXU.
    #      No im2col staging buffer (kills the old (M, 9*Cp) scratch and its
    #      9x patch stores). ----
    def conv3x3(pad_ref, w_ref, C):
        acc = jnp.zeros((M, Cp), jnp.float32)
        for dy in range(3):
            for dx in range(3):
                patch = pad_ref[:, dy:dy + Hp,
                                _WL - 1 + dx:_WL - 1 + dx + Wp, :]
                acc = acc + jnp.dot(patch.reshape(M, C), w_ref[dy * 3 + dx],
                                    preferred_element_type=jnp.float32)
        return acc

    # conv1 -> folded BN -> ReLU   (Dropout2d(p=0) == identity)
    h = jnp.maximum(conv3x3(pad1_ref, w1_ref, Cin) * s1_ref[...] + b1_ref[...],
                    0.0)
    pad2_ref[:, 1:Hp + 1, _WL:_WL + Wp, :] = (
        h.astype(cdt).reshape(Nb, Hp, Wp, Cp))

    # conv2 -> folded BN -> ReLU
    y = jnp.maximum(conv3x3(pad2_ref, w2_ref, Cp) * s2_ref[...] + b2_ref[...],
                    0.0)
    o_ref[...] = y.astype(o_ref.dtype)      # lane-dense (M_blk, Cp) store


# ----------------------------------------------------------------------------
# Host-side helpers
# ----------------------------------------------------------------------------
def _round_up(x, m):
    return ((x + m - 1) // m) * m


def _fold_conv_weight(w_hwio, cin_pad, cout_pad, dtype):
    """(3,3,Cin,Cout) HWIO -> zero-padded (9, cin_pad, cout_pad) tap matrices."""
    kh, kw, cin, cout = w_hwio.shape
    w = jnp.zeros((kh * kw, cin_pad, cout_pad), jnp.float32)
    w = w.at[:, :cin, :cout].set(
        w_hwio.reshape(kh * kw, cin, cout).astype(jnp.float32))
    return w.astype(dtype)


def _pad_channel_row(v, cout_pad):
    """Per-channel scale/bias -> (1, cout_pad) f32, zero-padded."""
    v = jnp.asarray(v, jnp.float32).reshape(1, -1)
    return jnp.pad(v, ((0, 0), (0, cout_pad - v.shape[1])))


def _vmem_capacity_bytes():
    """Per-core VMEM capacity; conservative 64 MiB (v7x) fallback."""
    try:
        return int(pltpu.get_tpu_info().vmem_capacity_bytes)
    except Exception:
        return 64 * 1024 * 1024


def _pick_block_n(N, H, W, Cin, Cp, cbytes, out_bytes, budget_bytes):
    """Largest divisor of N (capped at N//2 so the grid has >=2 steps for the
    v7x dual TensorCores) whose estimated per-step VMEM fits the budget.
    Estimate includes the f32 accumulators / live temporaries + 20% margin."""
    Hp, Wp = H // 2, W // 2
    WT = _WL + Wp + 1

    def est(nb):
        m = nb * Hp * Wp
        io = 2 * nb * H * W * Cin * 4 + 2 * m * Cp * out_bytes   # dbl-buffered
        wts = 2 * (9 * (Cin + Cp) * Cp * cbytes + 4 * Cp * 4)
        scr = nb * (Hp + 2) * WT * (Cin + Cp) * cbytes           # pad scratches
        live = m * (3 * Cp * 4 + 2 * Cp * cbytes + Cin * 4)      # acc/h/patch/pool
        return int(1.2 * (io + wts + scr + live))

    cap = max(1, N // 2)
    best = 1
    for nb in range(1, cap + 1):
        if N % nb == 0 and (nb * Hp * Wp) % 8 == 0 and est(nb) <= budget_bytes:
            best = nb
    return best


# ----------------------------------------------------------------------------
# Wrappers
# ----------------------------------------------------------------------------
def down_step_nhwc(x_nhwc, w1, s1, b1, w2, s2, b2, *,
                   use_bf16=True, block_n=None, out_dtype=jnp.float32):
    """x_nhwc: (N, H, W, Cin) f32  ->  (N, H//2, W//2, Cout) out_dtype."""
    N, H, W, Cin = x_nhwc.shape
    assert H % 2 == 0 and W % 2 == 0, "MaxPool2d(2) path assumes even H, W"
    Cout = w1.shape[3]
    Hp, Wp = H // 2, W // 2
    Cp = _round_up(Cout, 128)                 # lane-dense stores, full MXU N-dim
    cdt = jnp.bfloat16 if use_bf16 else jnp.float32
    cbytes = 2 if use_bf16 else 4
    out_bytes = jnp.dtype(out_dtype).itemsize

    # Generation-aware VMEM budgeting (v5e/v6e: 128 MiB, v7x: 64 MiB).
    vmem_cap = _vmem_capacity_bytes()
    vmem_limit = min(int(0.8 * vmem_cap), 100 * 1024 * 1024)
    budget = int(0.45 * vmem_cap)

    if block_n is None:
        block_n = _pick_block_n(N, H, W, Cin, Cp, cbytes, out_bytes, budget)
    if (block_n * Hp * Wp) % 8 != 0:
        block_n = N            # full block == full array dim -> no (8,) constraint
    assert N % block_n == 0, (N, block_n)
    grid = (N // block_n,)
    M_blk = block_n * Hp * Wp
    WT = _WL + Wp + 1

    # Weights / folded-BN params: lane-padded & cast on the host (tiny arrays).
    w1m = _fold_conv_weight(w1, Cin, Cp, cdt)      # (9, Cin, Cp)
    w2m = _fold_conv_weight(w2, Cp, Cp, cdt)       # (9, Cp,  Cp)
    s1p, b1p = _pad_channel_row(s1, Cp), _pad_channel_row(b1, Cp)
    s2p, b2p = _pad_channel_row(s2, Cp), _pad_channel_row(b2, Cp)

    # Free metadata reshape: both max-pool reductions become un-strided slices
    # inside the kernel (row pair on a size-2 axis, column pair on lanes).
    x_packed = x_nhwc.reshape(N, Hp, 2, Wp, 2 * Cin)

    out2d = pl.pallas_call(
        down_step_kernel,
        out_shape=jax.ShapeDtypeStruct((N * Hp * Wp, Cp), out_dtype),
        grid_spec=pltpu.PrefetchScalarGridSpec(
            num_scalar_prefetch=0,
            grid=grid,
            in_specs=[
                pl.BlockSpec((block_n, Hp, 2, Wp, 2 * Cin),
                             lambda n: (n, 0, 0, 0, 0)),
                pl.BlockSpec((9, Cin, Cp), lambda n: (0, 0, 0)),
                pl.BlockSpec((1, Cp), lambda n: (0, 0)),
                pl.BlockSpec((1, Cp), lambda n: (0, 0)),
                pl.BlockSpec((9, Cp, Cp), lambda n: (0, 0, 0)),
                pl.BlockSpec((1, Cp), lambda n: (0, 0)),
                pl.BlockSpec((1, Cp), lambda n: (0, 0)),
            ],
            out_specs=pl.BlockSpec((M_blk, Cp), lambda n: (n, 0)),
            scratch_shapes=[
                pltpu.VMEM((block_n, Hp + 2, WT, Cin), cdt),  # padded pooled img
                pltpu.VMEM((block_n, Hp + 2, WT, Cp), cdt),   # padded conv1 out
            ],
        ),
        compiler_params=pltpu.CompilerParams(
            dimension_semantics=("parallel",),   # images independent
            vmem_limit_bytes=vmem_limit,
        ),
    )(x_packed, w1m, s1p, b1p, w2m, s2p, b2p)

    # Pallas-layer consumers can take the padded (N,Hp,Wp,Cp) slab directly and
    # skip this slice; bf16 out_dtype halves the HBM writeback if tolerated.
    return out2d.reshape(N, Hp, Wp, Cp)[..., :Cout]


def down_step(x_nchw, w1, s1, b1, w2, s2, b2, **kwargs):
    """PyTorch-layout entry: (N, Cin, H, W) -> (N, Cout, H//2, W//2).

    Callers that can work in NHWC should use `down_step_nhwc` directly and
    skip the two wrapper transposes (each is an extra HBM round trip)."""
    x = jnp.transpose(x_nchw, (0, 2, 3, 1))          # NCHW -> NHWC
    out = down_step_nhwc(x, w1, s1, b1, w2, s2, b2, **kwargs)
    return jnp.transpose(out, (0, 3, 1, 2))          # NHWC -> NCHW


# ----------------------------------------------------------------------------
# Parameters + pure-JAX reference
# ----------------------------------------------------------------------------
def init_params(key, cin, cout, eps=1e-5):
    """Deterministic synthetic parameters (conv weights in HWIO, folded BN)."""
    ks = jax.random.split(key, 10)

    def bn_fold(kg, kb, km, kv, c):
        gamma = 1.0 + 0.1 * jax.random.normal(kg, (c,), jnp.float32)
        beta = 0.1 * jax.random.normal(kb, (c,), jnp.float32)
        running_mean = 0.1 * jax.random.normal(km, (c,), jnp.float32)
        running_var = jnp.abs(jax.random.normal(kv, (c,), jnp.float32)) + 0.5
        scale = gamma / jnp.sqrt(running_var + eps)
        bias = beta - running_mean * scale
        return scale.reshape(1, c), bias.reshape(1, c)

    w1 = 0.2 * jax.random.normal(ks[0], (3, 3, cin, cout), jnp.float32)   # HWIO
    w2 = 0.2 * jax.random.normal(ks[1], (3, 3, cout, cout), jnp.float32)  # HWIO
    s1, b1 = bn_fold(ks[2], ks[3], ks[4], ks[5], cout)
    s2, b2 = bn_fold(ks[6], ks[7], ks[8], ks[9], cout)
    return w1, s1, b1, w2, s2, b2


def ref_down_step(x_nchw, w1, s1, b1, w2, s2, b2):
    """Pure-JAX reference (same semantics as the PyTorch module, eval mode)."""
    x = jnp.transpose(x_nchw, (0, 2, 3, 1))
    pooled = lax.reduce_window(x, -jnp.inf, lax.max,
                               (1, 2, 2, 1), (1, 2, 2, 1), 'VALID')

    def block(h, w, s, b):
        y = lax.conv_general_dilated(
            h, w, (1, 1), 'SAME',
            dimension_numbers=('NHWC', 'HWIO', 'NHWC'))
        y = y * s.reshape(1, 1, 1, -1) + b.reshape(1, 1, 1, -1)
        return jnp.maximum(y, 0.0)

    h = block(pooled, w1, s1, b1)
    h = block(h, w2, s2, b2)
    return jnp.transpose(h, (0, 3, 1, 2))


# ----------------------------------------------------------------------------
# Self-test
# ----------------------------------------------------------------------------
if __name__ == "__main__":
    key = jax.random.PRNGKey(0)
    k_x, k_p = jax.random.split(key)

    N, Cin, Cout, H, W = 2, 4, 8, 16, 16
    x = jax.random.normal(k_x, (N, Cin, H, W), jnp.float32)
    params = init_params(k_p, Cin, Cout)

    ref = jax.block_until_ready(ref_down_step(x, *params))

    # f32 matmul path: tight match against the f32 reference.
    out_f32 = jax.block_until_ready(down_step(x, *params, use_bf16=False))
    assert out_f32.shape == (N, Cout, H // 2, W // 2), out_f32.shape
    err32 = float(jnp.max(jnp.abs(out_f32 - ref)))
    assert jnp.allclose(out_f32, ref, rtol=1e-3, atol=1e-3), \
        f"f32 path max abs err = {err32}"

    # bf16 matmul operands (f32 accumulation + f32 epilogue): bf16-level tol.
    out_bf16 = jax.block_until_ready(down_step(x, *params, use_bf16=True))
    assert out_bf16.shape == (N, Cout, H // 2, W // 2), out_bf16.shape
    err16 = float(jnp.max(jnp.abs(out_bf16 - ref)))
    assert jnp.allclose(out_bf16, ref, rtol=5e-2, atol=5e-2), \
        f"bf16 path max abs err = {err16}"

    print("KERNEL_OK")
</pallas_src>

<mosaic_0001>
module attributes {stable_mosaic.version = 11 : i64} {
  func.func @down_step_kernel(%arg0: i32, %arg1: memref<1x8x2x8x8xf32, #tpu.memory_space<vmem>>, %arg2: memref<9x4x128xf32, #tpu.memory_space<vmem>>, %arg3: memref<1x128xf32, #tpu.memory_space<vmem>>, %arg4: memref<1x128xf32, #tpu.memory_space<vmem>>, %arg5: memref<9x128x128xf32, #tpu.memory_space<vmem>>, %arg6: memref<1x128xf32, #tpu.memory_space<vmem>>, %arg7: memref<1x128xf32, #tpu.memory_space<vmem>>, %arg8: memref<64x128xf32, #tpu.memory_space<vmem>>, %arg9: memref<1x10x17x4xf32, #tpu.memory_space<vmem>>, %arg10: memref<1x10x17x128xf32, #tpu.memory_space<vmem>>) attributes {dimension_semantics = [#tpu.dimension_semantics<parallel>], iteration_bounds = array<i64: 2>, scalar_prefetch = 0 : i64, scratch_operands = 2 : i64, tpu.core_type = #tpu.core_type<tc>, window_params = [{transform_indices = @transform_0, window_bounds = array<i64: 1, 8, 2, 8, 8>}, {pipeline_mode = #tpu.pipeline_mode<synchronous>, transform_indices = @transform_1, window_bounds = array<i64: 9, 4, 128>}, {pipeline_mode = #tpu.pipeline_mode<synchronous>, transform_indices = @transform_2, window_bounds = array<i64: 1, 128>}, {pipeline_mode = #tpu.pipeline_mode<synchronous>, transform_indices = @transform_3, window_bounds = array<i64: 1, 128>}, {pipeline_mode = #tpu.pipeline_mode<synchronous>, transform_indices = @transform_4, window_bounds = array<i64: 9, 128, 128>}, {pipeline_mode = #tpu.pipeline_mode<synchronous>, transform_indices = @transform_5, window_bounds = array<i64: 1, 128>}, {pipeline_mode = #tpu.pipeline_mode<synchronous>, transform_indices = @transform_6, window_bounds = array<i64: 1, 128>}, {transform_indices = @transform_7, window_bounds = array<i64: 64, 128>}]} {
    %cst = arith.constant 0.000000e+00 : f32
    %0 = vector.broadcast %cst : f32 to vector<1x1x17x4xf32>
    %c0 = arith.constant 0 : index
    %c0_0 = arith.constant 0 : index
    %c0_1 = arith.constant 0 : index
    %c0_2 = arith.constant 0 : index
    %1 = vector.load %arg9[%c0, %c0_0, %c0_1, %c0_2] : memref<1x10x17x4xf32, #tpu.memory_space<vmem>>, vector<1x1x17x4xf32>
    tpu.vector_store %arg9[%c0, %c0_0, %c0_1, %c0_2], %0 {strides = array<i32>} : memref<1x10x17x4xf32, #tpu.memory_space<vmem>>, vector<1x1x17x4xf32>,
    %cst_3 = arith.constant 0.000000e+00 : f32
    %2 = vector.broadcast %cst_3 : f32 to vector<1x1x17x4xf32>
    %c0_4 = arith.constant 0 : index
    %c9 = arith.constant 9 : index
    %c0_5 = arith.constant 0 : index
    %c0_6 = arith.constant 0 : index
    %3 = vector.load %arg9[%c0_4, %c9, %c0_5, %c0_6] : memref<1x10x17x4xf32, #tpu.memory_space<vmem>>, vector<1x1x17x4xf32>
    tpu.vector_store %arg9[%c0_4, %c9, %c0_5, %c0_6], %2 {strides = array<i32>} : memref<1x10x17x4xf32, #tpu.memory_space<vmem>>, vector<1x1x17x4xf32>,
    %cst_7 = arith.constant 0.000000e+00 : f32
    %4 = vector.broadcast %cst_7 : f32 to vector<1x10x1x4xf32>
    %c0_8 = arith.constant 0 : index
    %c0_9 = arith.constant 0 : index
    %c7 = arith.constant 7 : index
    %c0_10 = arith.constant 0 : index
    %5 = vector.load %arg9[%c0_8, %c0_9, %c7, %c0_10] : memref<1x10x17x4xf32, #tpu.memory_space<vmem>>, vector<1x10x1x4xf32>
    tpu.vector_store %arg9[%c0_8, %c0_9, %c7, %c0_10], %4 {strides = array<i32>} : memref<1x10x17x4xf32, #tpu.memory_space<vmem>>, vector<1x10x1x4xf32>,
    %cst_11 = arith.constant 0.000000e+00 : f32
    %6 = vector.broadcast %cst_11 : f32 to vector<1x10x1x4xf32>
    %c0_12 = arith.constant 0 : index
    %c0_13 = arith.constant 0 : index
    %c16 = arith.constant 16 : index
    %c0_14 = arith.constant 0 : index
    %7 = vector.load %arg9[%c0_12, %c0_13, %c16, %c0_14] : memref<1x10x17x4xf32, #tpu.memory_space<vmem>>, vector<1x10x1x4xf32>
    tpu.vector_store %arg9[%c0_12, %c0_13, %c16, %c0_14], %6 {strides = array<i32>} : memref<1x10x17x4xf32, #tpu.memory_space<vmem>>, vector<1x10x1x4xf32>,
    %cst_15 = arith.constant 0.000000e+00 : f32
    %8 = vector.broadcast %cst_15 : f32 to vector<1x1x17x128xf32>
    %c0_16 = arith.constant 0 : index
    %c0_17 = arith.constant 0 : index
    %c0_18 = arith.constant 0 : index
    %c0_19 = arith.constant 0 : index
    %9 = vector.load %arg10[%c0_16, %c0_17, %c0_18, %c0_19] : memref<1x10x17x128xf32, #tpu.memory_space<vmem>>, vector<1x1x17x128xf32>
    tpu.vector_store %arg10[%c0_16, %c0_17, %c0_18, %c0_19], %8 {strides = array<i32>} : memref<1x10x17x128xf32, #tpu.memory_space<vmem>>, vector<1x1x17x128xf32>,
    %cst_20 = arith.constant 0.000000e+00 : f32
    %10 = vector.broadcast %cst_20 : f32 to vector<1x1x17x128xf32>
    %c0_21 = arith.constant 0 : index
    %c9_22 = arith.constant 9 : index
    %c0_23 = arith.constant 0 : index
    %c0_24 = arith.constant 0 : index
    %11 = vector.load %arg10[%c0_21, %c9_22, %c0_23, %c0_24] : memref<1x10x17x128xf32, #tpu.memory_space<vmem>>, vector<1x1x17x128xf32>
    tpu.vector_store %arg10[%c0_21, %c9_22, %c0_23, %c0_24], %10 {strides = array<i32>} : memref<1x10x17x128xf32, #tpu.memory_space<vmem>>, vector<1x1x17x128xf32>,
    %cst_25 = arith.constant 0.000000e+00 : f32
    %12 = vector.broadcast %cst_25 : f32 to vector<1x10x1x128xf32>
    %c0_26 = arith.constant 0 : index
    %c0_27 = arith.constant 0 : index
    %c7_28 = arith.constant 7 : index
    %c0_29 = arith.constant 0 : index
    %13 = vector.load %arg10[%c0_26, %c0_27, %c7_28, %c0_29] : memref<1x10x17x128xf32, #tpu.memory_space<vmem>>, vector<1x10x1x128xf32>
    tpu.vector_store %arg10[%c0_26, %c0_27, %c7_28, %c0_29], %12 {strides = array<i32>} : memref<1x10x17x128xf32, #tpu.memory_space<vmem>>, vector<1x10x1x128xf32>,
    %cst_30 = arith.constant 0.000000e+00 : f32
    %14 = vector.broadcast %cst_30 : f32 to vector<1x10x1x128xf32>
    %c0_31 = arith.constant 0 : index
    %c0_32 = arith.constant 0 : index
    %c16_33 = arith.constant 16 : index
    %c0_34 = arith.constant 0 : index
    %15 = vector.load %arg10[%c0_31, %c0_32, %c16_33, %c0_34] : memref<1x10x17x128xf32, #tpu.memory_space<vmem>>, vector<1x10x1x128xf32>
    tpu.vector_store %arg10[%c0_31, %c0_32, %c16_33, %c0_34], %14 {strides = array<i32>} : memref<1x10x17x128xf32, #tpu.memory_space<vmem>>, vector<1x10x1x128xf32>,
    %c0_35 = arith.constant 0 : index
    %c0_36 = arith.constant 0 : index
    %c0_37 = arith.constant 0 : index
    %c0_38 = arith.constant 0 : index
    %c0_39 = arith.constant 0 : index
    %16 = vector.load %arg1[%c0_35, %c0_36, %c0_37, %c0_38, %c0_39] : memref<1x8x2x8x8xf32, #tpu.memory_space<vmem>>, vector<1x8x2x8x8xf32>
    %17 = vector.extract_strided_slice %16 {offsets = [0, 0, 0, 0, 0], sizes = [1, 8, 1, 8, 8], strides = [1, 1, 1, 1, 1]} : vector<1x8x2x8x8xf32> to vector<1x8x1x8x8xf32>
    %18 = vector.shape_cast %17 : vector<1x8x1x8x8xf32> to vector<1x8x8x8xf32>
    %19 = vector.extract_strided_slice %16 {offsets = [0, 0, 1, 0, 0], sizes = [1, 8, 1, 8, 8], strides = [1, 1, 1, 1, 1]} : vector<1x8x2x8x8xf32> to vector<1x8x1x8x8xf32>
    %20 = vector.shape_cast %19 : vector<1x8x1x8x8xf32> to vector<1x8x8x8xf32>
    %21 = arith.maximumf %18, %20 : vector<1x8x8x8xf32>
    %22 = vector.extract_strided_slice %21 {offsets = [0, 0, 0, 0], sizes = [1, 8, 8, 4], strides = [1, 1, 1, 1]} : vector<1x8x8x8xf32> to vector<1x8x8x4xf32>
    %23 = vector.extract_strided_slice %21 {offsets = [0, 0, 0, 4], sizes = [1, 8, 8, 4], strides = [1, 1, 1, 1]} : vector<1x8x8x8xf32> to vector<1x8x8x4xf32>
    %24 = arith.maximumf %22, %23 : vector<1x8x8x4xf32>
    %c0_40 = arith.constant 0 : index
    %c1 = arith.constant 1 : index
    %c8 = arith.constant 8 : index
    %c0_41 = arith.constant 0 : index
    %25 = vector.load %arg9[%c0_40, %c1, %c8, %c0_41] : memref<1x10x17x4xf32, #tpu.memory_space<vmem>>, vector<1x8x8x4xf32>
    tpu.vector_store %arg9[%c0_40, %c1, %c8, %c0_41], %24 {strides = array<i32>} : memref<1x10x17x4xf32, #tpu.memory_space<vmem>>, vector<1x8x8x4xf32>,
    %cst_42 = arith.constant 0.000000e+00 : f32
    %26 = vector.broadcast %cst_42 : f32 to vector<64x128xf32>
    %c0_43 = arith.constant 0 : index
    %c0_44 = arith.constant 0 : index
    %c7_45 = arith.constant 7 : index
    %c0_46 = arith.constant 0 : index
    %27 = vector.load %arg9[%c0_43, %c0_44, %c7_45, %c0_46] : memref<1x10x17x4xf32, #tpu.memory_space<vmem>>, vector<1x8x8x4xf32>
    %28 = vector.shape_cast %27 : vector<1x8x8x4xf32> to vector<64x4xf32>
    %c0_47 = arith.constant 0 : index
    %c0_48 = arith.constant 0 : index
    %c0_49 = arith.constant 0 : index
    %29 = vector.load %arg2[%c0_47, %c0_48, %c0_49] : memref<9x4x128xf32, #tpu.memory_space<vmem>>, vector<1x4x128xf32>
    %30 = vector.shape_cast %29 : vector<1x4x128xf32> to vector<4x128xf32>
    %cst_50 = arith.constant dense<0.000000e+00> : vector<64x128xf32>
    %31 = tpu.matmul %28, %30, %cst_50 {dimension_numbers = #tpu.dot_dimension_numbers<[1], [0], [0], [1], [0, 0, 1, 1], [], []>} : vector<64x4xf32>, vector<4x128xf32>, vector<64x128xf32> -> vector<64x128xf32>
    %32 = arith.addf %26, %31 : vector<64x128xf32>
    %c0_51 = arith.constant 0 : index
    %c0_52 = arith.constant 0 : index
    %c8_53 = arith.constant 8 : index
    %c0_54 = arith.constant 0 : index
    %33 = vector.load %arg9[%c0_51, %c0_52, %c8_53, %c0_54] : memref<1x10x17x4xf32, #tpu.memory_space<vmem>>, vector<1x8x8x4xf32>
    %34 = vector.shape_cast %33 : vector<1x8x8x4xf32> to vector<64x4xf32>
    %c1_55 = arith.constant 1 : index
    %c0_56 = arith.constant 0 : index
    %c0_57 = arith.constant 0 : index
    %35 = vector.load %arg2[%c1_55, %c0_56, %c0_57] : memref<9x4x128xf32, #tpu.memory_space<vmem>>, vector<1x4x128xf32>
    %36 = vector.shape_cast %35 : vector<1x4x128xf32> to vector<4x128xf32>
    %cst_58 = arith.constant dense<0.000000e+00> : vector<64x128xf32>
    %37 = tpu.matmul %34, %36, %cst_58 {dimension_numbers = #tpu.dot_dimension_numbers<[1], [0], [0], [1], [0, 0, 1, 1], [], []>} : vector<64x4xf32>, vector<4x128xf32>, vector<64x128xf32> -> vector<64x128xf32>
    %38 = arith.addf %32, %37 : vector<64x128xf32>
    %c0_59 = arith.constant 0 : index
    %c0_60 = arith.constant 0 : index
    %c9_61 = arith.constant 9 : index
    %c0_62 = arith.constant 0 : index
    %39 = vector.load %arg9[%c0_59, %c0_60, %c9_61, %c0_62] : memref<1x10x17x4xf32, #tpu.memory_space<vmem>>, vector<1x8x8x4xf32>
    %40 = vector.shape_cast %39 : vector<1x8x8x4xf32> to vector<64x4xf32>
    %c2 = arith.constant 2 : index
    %c0_63 = arith.constant 0 : index
    %c0_64 = arith.constant 0 : index
    %41 = vector.load %arg2[%c2, %c0_63, %c0_64] : memref<9x4x128xf32, #tpu.memory_space<vmem>>, vector<1x4x128xf32>
    %42 = vector.shape_cast %41 : vector<1x4x128xf32> to vector<4x128xf32>
    %cst_65 = arith.constant dense<0.000000e+00> : vector<64x128xf32>
    %43 = tpu.matmul %40, %42, %cst_65 {dimension_numbers = #tpu.dot_dimension_numbers<[1], [0], [0], [1], [0, 0, 1, 1], [], []>} : vector<64x4xf32>, vector<4x128xf32>, vector<64x128xf32> -> vector<64x128xf32>
    %44 = arith.addf %38, %43 : vector<64x128xf32>
    %c0_66 = arith.constant 0 : index
    %c1_67 = arith.constant 1 : index
    %c7_68 = arith.constant 7 : index
    %c0_69 = arith.constant 0 : index
    %45 = vector.load %arg9[%c0_66, %c1_67, %c7_68, %c0_69] : memref<1x10x17x4xf32, #tpu.memory_space<vmem>>, vector<1x8x8x4xf32>
    %46 = vector.shape_cast %45 : vector<1x8x8x4xf32> to vector<64x4xf32>
    %c3 = arith.constant 3 : index
    %c0_70 = arith.constant 0 : index
    %c0_71 = arith.constant 0 : index
    %47 = vector.load %arg2[%c3, %c0_70, %c0_71] : memref<9x4x128xf32, #tpu.memory_space<vmem>>, vector<1x4x128xf32>
    %48 = vector.shape_cast %47 : vector<1x4x128xf32> to vector<4x128xf32>
    %cst_72 = arith.constant dense<0.000000e+00> : vector<64x128xf32>
    %49 = tpu.matmul %46, %48, %cst_72 {dimension_numbers = #tpu.dot_dimension_numbers<[1], [0], [0], [1], [0, 0, 1, 1], [], []>} : vector<64x4xf32>, vector<4x128xf32>, vector<64x128xf32> -> vector<64x128xf32>
    %50 = arith.addf %44, %49 : vector<64x128xf32>
    %c0_73 = arith.constant 0 : index
    %c1_74 = arith.constant 1 : index
    %c8_75 = arith.constant 8 : index
    %c0_76 = arith.constant 0 : index
    %51 = vector.load %arg9[%c0_73, %c1_74, %c8_75, %c0_76] : memref<1x10x17x4xf32, #tpu.memory_space<vmem>>, vector<1x8x8x4xf32>
    %52 = vector.shape_cast %51 : vector<1x8x8x4xf32> to vector<64x4xf32>
    %c4 = arith.constant 4 : index
    %c0_77 = arith.constant 0 : index
    %c0_78 = arith.constant 0 : index
    %53 = vector.load %arg2[%c4, %c0_77, %c0_78] : memref<9x4x128xf32, #tpu.memory_space<vmem>>, vector<1x4x128xf32>
    %54 = vector.shape_cast %53 : vector<1x4x128xf32> to vector<4x128xf32>
    %cst_79 = arith.constant dense<0.000000e+00> : vector<64x128xf32>
    %55 = tpu.matmul %52, %54, %cst_79 {dimension_numbers = #tpu.dot_dimension_numbers<[1], [0], [0], [1], [0, 0, 1, 1], [], []>} : vector<64x4xf32>, vector<4x128xf32>, vector<64x128xf32> -> vector<64x128xf32>
    %56 = arith.addf %50, %55 : vector<64x128xf32>
    %c0_80 = arith.constant 0 : index
    %c1_81 = arith.constant 1 : index
    %c9_82 = arith.constant 9 : index
    %c0_83 = arith.constant 0 : index
    %57 = vector.load %arg9[%c0_80, %c1_81, %c9_82, %c0_83] : memref<1x10x17x4xf32, #tpu.memory_space<vmem>>, vector<1x8x8x4xf32>
    %58 = vector.shape_cast %57 : vector<1x8x8x4xf32> to vector<64x4xf32>
    %c5 = arith.constant 5 : index
    %c0_84 = arith.constant 0 : index
    %c0_85 = arith.constant 0 : index
    %59 = vector.load %arg2[%c5, %c0_84, %c0_85] : memref<9x4x128xf32, #tpu.memory_space<vmem>>, vector<1x4x128xf32>
    %60 = vector.shape_cast %59 : vector<1x4x128xf32> to vector<4x128xf32>
    %cst_86 = arith.constant dense<0.000000e+00> : vector<64x128xf32>
    %61 = tpu.matmul %58, %60, %cst_86 {dimension_numbers = #tpu.dot_dimension_numbers<[1], [0], [0], [1], [0, 0, 1, 1], [], []>} : vector<64x4xf32>, vector<4x128xf32>, vector<64x128xf32> -> vector<64x128xf32>
    %62 = arith.addf %56, %61 : vector<64x128xf32>
    %c0_87 = arith.constant 0 : index
    %c2_88 = arith.constant 2 : index
    %c7_89 = arith.constant 7 : index
    %c0_90 = arith.constant 0 : index
    %63 = vector.load %arg9[%c0_87, %c2_88, %c7_89, %c0_90] : memref<1x10x17x4xf32, #tpu.memory_space<vmem>>, vector<1x8x8x4xf32>
    %64 = vector.shape_cast %63 : vector<1x8x8x4xf32> to vector<64x4xf32>
    %c6 = arith.constant 6 : index
    %c0_91 = arith.constant 0 : index
    %c0_92 = arith.constant 0 : index
    %65 = vector.load %arg2[%c6, %c0_91, %c0_92] : memref<9x4x128xf32, #tpu.memory_space<vmem>>, vector<1x4x128xf32>
    %66 = vector.shape_cast %65 : vector<1x4x128xf32> to vector<4x128xf32>
    %cst_93 = arith.constant dense<0.000000e+00> : vector<64x128xf32>
    %67 = tpu.matmul %64, %66, %cst_93 {dimension_numbers = #tpu.dot_dimension_numbers<[1], [0], [0], [1], [0, 0, 1, 1], [], []>} : vector<64x4xf32>, vector<4x128xf32>, vector<64x128xf32> -> vector<64x128xf32>
    %68 = arith.addf %62, %67 : vector<64x128xf32>
    %c0_94 = arith.constant 0 : index
    %c2_95 = arith.constant 2 : index
    %c8_96 = arith.constant 8 : index
    %c0_97 = arith.constant 0 : index
    %69 = vector.load %arg9[%c0_94, %c2_95, %c8_96, %c0_97] : memref<1x10x17x4xf32, #tpu.memory_space<vmem>>, vector<1x8x8x4xf32>
    %70 = vector.shape_cast %69 : vector<1x8x8x4xf32> to vector<64x4xf32>
    %c7_98 = arith.constant 7 : index
    %c0_99 = arith.constant 0 : index
    %c0_100 = arith.constant 0 : index
    %71 = vector.load %arg2[%c7_98, %c0_99, %c0_100] : memref<9x4x128xf32, #tpu.memory_space<vmem>>, vector<1x4x128xf32>
    %72 = vector.shape_cast %71 : vector<1x4x128xf32> to vector<4x128xf32>
    %cst_101 = arith.constant dense<0.000000e+00> : vector<64x128xf32>
    %73 = tpu.matmul %70, %72, %cst_101 {dimension_numbers = #tpu.dot_dimension_numbers<[1], [0], [0], [1], [0, 0, 1, 1], [], []>} : vector<64x4xf32>, vector<4x128xf32>, vector<64x128xf32> -> vector<64x128xf32>
    %74 = arith.addf %68, %73 : vector<64x128xf32>
    %c0_102 = arith.constant 0 : index
    %c2_103 = arith.constant 2 : index
    %c9_104 = arith.constant 9 : index
    %c0_105 = arith.constant 0 : index
    %75 = vector.load %arg9[%c0_102, %c2_103, %c9_104, %c0_105] : memref<1x10x17x4xf32, #tpu.memory_space<vmem>>, vector<1x8x8x4xf32>
    %76 = vector.shape_cast %75 : vector<1x8x8x4xf32> to vector<64x4xf32>
    %c8_106 = arith.constant 8 : index
    %c0_107 = arith.constant 0 : index
    %c0_108 = arith.constant 0 : index
    %77 = vector.load %arg2[%c8_106, %c0_107, %c0_108] : memref<9x4x128xf32, #tpu.memory_space<vmem>>, vector<1x4x128xf32>
    %78 = vector.shape_cast %77 : vector<1x4x128xf32> to vector<4x128xf32>
    %cst_109 = arith.constant dense<0.000000e+00> : vector<64x128xf32>
    %79 = tpu.matmul %76, %78, %cst_109 {dimension_numbers = #tpu.dot_dimension_numbers<[1], [0], [0], [1], [0, 0, 1, 1], [], []>} : vector<64x4xf32>, vector<4x128xf32>, vector<64x128xf32> -> vector<64x128xf32>
    %80 = arith.addf %74, %79 : vector<64x128xf32>
    %c0_110 = arith.constant 0 : index
    %c0_111 = arith.constant 0 : index
    %81 = vector.load %arg3[%c0_110, %c0_111] : memref<1x128xf32, #tpu.memory_space<vmem>>, vector<1x128xf32>
    %82 = vector.broadcast %81 : vector<1x128xf32> to vector<64x128xf32>
    %83 = arith.mulf %80, %82 : vector<64x128xf32>
    %c0_112 = arith.constant 0 : index
    %c0_113 = arith.constant 0 : index
    %84 = vector.load %arg4[%c0_112, %c0_113] : memref<1x128xf32, #tpu.memory_space<vmem>>, vector<1x128xf32>
    %85 = vector.broadcast %84 : vector<1x128xf32> to vector<64x128xf32>
    %86 = arith.addf %83, %85 : vector<64x128xf32>
    %cst_114 = arith.constant 0.000000e+00 : f32
    %87 = vector.broadcast %cst_114 : f32 to vector<64x128xf32>
    %88 = arith.maximumf %86, %87 : vector<64x128xf32>
    %89 = vector.shape_cast %88 : vector<64x128xf32> to vector<1x8x8x128xf32>
    %c0_115 = arith.constant 0 : index
    %c1_116 = arith.constant 1 : index
    %c8_117 = arith.constant 8 : index
    %c0_118 = arith.constant 0 : index
    %90 = vector.load %arg10[%c0_115, %c1_116, %c8_117, %c0_118] : memref<1x10x17x128xf32, #tpu.memory_space<vmem>>, vector<1x8x8x128xf32>
    tpu.vector_store %arg10[%c0_115, %c1_116, %c8_117, %c0_118], %89 {strides = array<i32>} : memref<1x10x17x128xf32, #tpu.memory_space<vmem>>, vector<1x8x8x128xf32>,
    %cst_119 = arith.constant 0.000000e+00 : f32
    %91 = vector.broadcast %cst_119 : f32 to vector<64x128xf32>
    %c0_120 = arith.constant 0 : index
    %c0_121 = arith.constant 0 : index
    %c7_122 = arith.constant 7 : index
    %c0_123 = arith.constant 0 : index
    %92 = vector.load %arg10[%c0_120, %c0_121, %c7_122, %c0_123] : memref<1x10x17x128xf32, #tpu.memory_space<vmem>>, vector<1x8x8x128xf32>
    %93 = vector.shape_cast %92 : vector<1x8x8x128xf32> to vector<64x128xf32>
    %c0_124 = arith.constant 0 : index
    %c0_125 = arith.constant 0 : index
    %c0_126 = arith.constant 0 : index
    %94 = vector.load %arg5[%c0_124, %c0_125, %c0_126] : memref<9x128x128xf32, #tpu.memory_space<vmem>>, vector<1x128x128xf32>
    %95 = vector.shape_cast %94 : vector<1x128x128xf32> to vector<128x128xf32>
    %cst_127 = arith.constant dense<0.000000e+00> : vector<64x128xf32>
    %96 = tpu.matmul %93, %95, %cst_127 {dimension_numbers = #tpu.dot_dimension_numbers<[1], [0], [0], [1], [0, 0, 1, 1], [], []>} : vector<64x128xf32>, vector<128x128xf32>, vector<64x128xf32> -> vector<64x128xf32>
    %97 = arith.addf %91, %96 : vector<64x128xf32>
    %c0_128 = arith.constant 0 : index
    %c0_129 = arith.constant 0 : index
    %c8_130 = arith.constant 8 : index
    %c0_131 = arith.constant 0 : index
    %98 = vector.load %arg10[%c0_128, %c0_129, %c8_130, %c0_131] : memref<1x10x17x128xf32, #tpu.memory_space<vmem>>, vector<1x8x8x128xf32>
    %99 = vector.shape_cast %98 : vector<1x8x8x128xf32> to vector<64x128xf32>
    %c1_132 = arith.constant 1 : index
    %c0_133 = arith.constant 0 : index
    %c0_134 = arith.constant 0 : index
    %100 = vector.load %arg5[%c1_132, %c0_133, %c0_134] : memref<9x128x128xf32, #tpu.memory_space<vmem>>, vector<1x128x128xf32>
    %101 = vector.shape_cast %100 : vector<1x128x128xf32> to vector<128x128xf32>
    %cst_135 = arith.constant dense<0.000000e+00> : vector<64x128xf32>
    %102 = tpu.matmul %99, %101, %cst_135 {dimension_numbers = #tpu.dot_dimension_numbers<[1], [0], [0], [1], [0, 0, 1, 1], [], []>} : vector<64x128xf32>, vector<128x128xf32>, vector<64x128xf32> -> vector<64x128xf32>
    %103 = arith.addf %97, %102 : vector<64x128xf32>
    %c0_136 = arith.constant 0 : index
    %c0_137 = arith.constant 0 : index
    %c9_138 = arith.constant 9 : index
    %c0_139 = arith.constant 0 : index
    %104 = vector.load %arg10[%c0_136, %c0_137, %c9_138, %c0_139] : memref<1x10x17x128xf32, #tpu.memory_space<vmem>>, vector<1x8x8x128xf32>
    %105 = vector.shape_cast %104 : vector<1x8x8x128xf32> to vector<64x128xf32>
    %c2_140 = arith.constant 2 : index
    %c0_141 = arith.constant 0 : index
    %c0_142 = arith.constant 0 : index
    %106 = vector.load %arg5[%c2_140, %c0_141, %c0_142] : memref<9x128x128xf32, #tpu.memory_space<vmem>>, vector<1x128x128xf32>
    %107 = vector.shape_cast %106 : vector<1x128x128xf32> to vector<128x128xf32>
    %cst_143 = arith.constant dense<0.000000e+00> : vector<64x128xf32>
    %108 = tpu.matmul %105, %107, %cst_143 {dimension_numbers = #tpu.dot_dimension_numbers<[1], [0], [0], [1], [0, 0, 1, 1], [], []>} : vector<64x128xf32>, vector<128x128xf32>, vector<64x128xf32> -> vector<64x128xf32>
    %109 = arith.addf %103, %108 : vector<64x128xf32>
    %c0_144 = arith.constant 0 : index
    %c1_145 = arith.constant 1 : index
    %c7_146 = arith.constant 7 : index
    %c0_147 = arith.constant 0 : index
    %110 = vector.load %arg10[%c0_144, %c1_145, %c7_146, %c0_147] : memref<1x10x17x128xf32, #tpu.memory_space<vmem>>, vector<1x8x8x128xf32>
    %111 = vector.shape_cast %110 : vector<1x8x8x128xf32> to vector<64x128xf32>
    %c3_148 = arith.constant 3 : index
    %c0_149 = arith.constant 0 : index
    %c0_150 = arith.constant 0 : index
    %112 = vector.load %arg5[%c3_148, %c0_149, %c0_150] : memref<9x128x128xf32, #tpu.memory_space<vmem>>, vector<1x128x128xf32>
    %113 = vector.shape_cast %112 : vector<1x128x128xf32> to vector<128x128xf32>
    %cst_151 = arith.constant dense<0.000000e+00> : vector<64x128xf32>
    %114 = tpu.matmul %111, %113, %cst_151 {dimension_numbers = #tpu.dot_dimension_numbers<[1], [0], [0], [1], [0, 0, 1, 1], [], []>} : vector<64x128xf32>, vector<128x128xf32>, vector<64x128xf32> -> vector<64x128xf32>
    %115 = arith.addf %109, %114 : vector<64x128xf32>
    %c0_152 = arith.constant 0 : index
    %c1_153 = arith.constant 1 : index
    %c8_154 = arith.constant 8 : index
    %c0_155 = arith.constant 0 : index
    %116 = vector.load %arg10[%c0_152, %c1_153, %c8_154, %c0_155] : memref<1x10x17x128xf32, #tpu.memory_space<vmem>>, vector<1x8x8x128xf32>
    %117 = vector.shape_cast %116 : vector<1x8x8x128xf32> to vector<64x128xf32>
    %c4_156 = arith.constant 4 : index
    %c0_157 = arith.constant 0 : index
    %c0_158 = arith.constant 0 : index
    %118 = vector.load %arg5[%c4_156, %c0_157, %c0_158] : memref<9x128x128xf32, #tpu.memory_space<vmem>>, vector<1x128x128xf32>
    %119 = vector.shape_cast %118 : vector<1x128x128xf32> to vector<128x128xf32>
    %cst_159 = arith.constant dense<0.000000e+00> : vector<64x128xf32>
    %120 = tpu.matmul %117, %119, %cst_159 {dimension_numbers = #tpu.dot_dimension_numbers<[1], [0], [0], [1], [0, 0, 1, 1], [], []>} : vector<64x128xf32>, vector<128x128xf32>, vector<64x128xf32> -> vector<64x128xf32>
    %121 = arith.addf %115, %120 : vector<64x128xf32>
    %c0_160 = arith.constant 0 : index
    %c1_161 = arith.constant 1 : index
    %c9_162 = arith.constant 9 : index
    %c0_163 = arith.constant 0 : index
    %122 = vector.load %arg10[%c0_160, %c1_161, %c9_162, %c0_163] : memref<1x10x17x128xf32, #tpu.memory_space<vmem>>, vector<1x8x8x128xf32>
    %123 = vector.shape_cast %122 : vector<1x8x8x128xf32> to vector<64x128xf32>
    %c5_164 = arith.constant 5 : index
    %c0_165 = arith.constant 0 : index
    %c0_166 = arith.constant 0 : index
    %124 = vector.load %arg5[%c5_164, %c0_165, %c0_166] : memref<9x128x128xf32, #tpu.memory_space<vmem>>, vector<1x128x128xf32>
    %125 = vector.shape_cast %124 : vector<1x128x128xf32> to vector<128x128xf32>
    %cst_167 = arith.constant dense<0.000000e+00> : vector<64x128xf32>
    %126 = tpu.matmul %123, %125, %cst_167 {dimension_numbers = #tpu.dot_dimension_numbers<[1], [0], [0], [1], [0, 0, 1, 1], [], []>} : vector<64x128xf32>, vector<128x128xf32>, vector<64x128xf32> -> vector<64x128xf32>
    %127 = arith.addf %121, %126 : vector<64x128xf32>
    %c0_168 = arith.constant 0 : index
    %c2_169 = arith.constant 2 : index
    %c7_170 = arith.constant 7 : index
    %c0_171 = arith.constant 0 : index
    %128 = vector.load %arg10[%c0_168, %c2_169, %c7_170, %c0_171] : memref<1x10x17x128xf32, #tpu.memory_space<vmem>>, vector<1x8x8x128xf32>
    %129 = vector.shape_cast %128 : vector<1x8x8x128xf32> to vector<64x128xf32>
    %c6_172 = arith.constant 6 : index
    %c0_173 = arith.constant 0 : index
    %c0_174 = arith.constant 0 : index
    %130 = vector.load %arg5[%c6_172, %c0_173, %c0_174] : memref<9x128x128xf32, #tpu.memory_space<vmem>>, vector<1x128x128xf32>
    %131 = vector.shape_cast %130 : vector<1x128x128xf32> to vector<128x128xf32>
    %cst_175 = arith.constant dense<0.000000e+00> : vector<64x128xf32>
    %132 = tpu.matmul %129, %131, %cst_175 {dimension_numbers = #tpu.dot_dimension_numbers<[1], [0], [0], [1], [0, 0, 1, 1], [], []>} : vector<64x128xf32>, vector<128x128xf32>, vector<64x128xf32> -> vector<64x128xf32>
    %133 = arith.addf %127, %132 : vector<64x128xf32>
    %c0_176 = arith.constant 0 : index
    %c2_177 = arith.constant 2 : index
    %c8_178 = arith.constant 8 : index
    %c0_179 = arith.constant 0 : index
    %134 = vector.load %arg10[%c0_176, %c2_177, %c8_178, %c0_179] : memref<1x10x17x128xf32, #tpu.memory_space<vmem>>, vector<1x8x8x128xf32>
    %135 = vector.shape_cast %134 : vector<1x8x8x128xf32> to vector<64x128xf32>
    %c7_180 = arith.constant 7 : index
    %c0_181 = arith.constant 0 : index
    %c0_182 = arith.constant 0 : index
    %136 = vector.load %arg5[%c7_180, %c0_181, %c0_182] : memref<9x128x128xf32, #tpu.memory_space<vmem>>, vector<1x128x128xf32>
    %137 = vector.shape_cast %136 : vector<1x128x128xf32> to vector<128x128xf32>
    %cst_183 = arith.constant dense<0.000000e+00> : vector<64x128xf32>
    %138 = tpu.matmul %135, %137, %cst_183 {dimension_numbers = #tpu.dot_dimension_numbers<[1], [0], [0], [1], [0, 0, 1, 1], [], []>} : vector<64x128xf32>, vector<128x128xf32>, vector<64x128xf32> -> vector<64x128xf32>
    %139 = arith.addf %133, %138 : vector<64x128xf32>
    %c0_184 = arith.constant 0 : index
    %c2_185 = arith.constant 2 : index
    %c9_186 = arith.constant 9 : index
    %c0_187 = arith.constant 0 : index
    %140 = vector.load %arg10[%c0_184, %c2_185, %c9_186, %c0_187] : memref<1x10x17x128xf32, #tpu.memory_space<vmem>>, vector<1x8x8x128xf32>
    %141 = vector.shape_cast %140 : vector<1x8x8x128xf32> to vector<64x128xf32>
    %c8_188 = arith.constant 8 : index
    %c0_189 = arith.constant 0 : index
    %c0_190 = arith.constant 0 : index
    %142 = vector.load %arg5[%c8_188, %c0_189, %c0_190] : memref<9x128x128xf32, #tpu.memory_space<vmem>>, vector<1x128x128xf32>
    %143 = vector.shape_cast %142 : vector<1x128x128xf32> to vector<128x128xf32>
    %cst_191 = arith.constant dense<0.000000e+00> : vector<64x128xf32>
    %144 = tpu.matmul %141, %143, %cst_191 {dimension_numbers = #tpu.dot_dimension_numbers<[1], [0], [0], [1], [0, 0, 1, 1], [], []>} : vector<64x128xf32>, vector<128x128xf32>, vector<64x128xf32> -> vector<64x128xf32>
    %145 = arith.addf %139, %144 : vector<64x128xf32>
    %c0_192 = arith.constant 0 : index
    %c0_193 = arith.constant 0 : index
    %146 = vector.load %arg6[%c0_192, %c0_193] : memref<1x128xf32, #tpu.memory_space<vmem>>, vector<1x128xf32>
    %147 = vector.broadcast %146 : vector<1x128xf32> to vector<64x128xf32>
    %148 = arith.mulf %145, %147 : vector<64x128xf32>
    %c0_194 = arith.constant 0 : index
    %c0_195 = arith.constant 0 : index
    %149 = vector.load %arg7[%c0_194, %c0_195] : memref<1x128xf32, #tpu.memory_space<vmem>>, vector<1x128xf32>
    %150 = vector.broadcast %149 : vector<1x128xf32> to vector<64x128xf32>
    %151 = arith.addf %148, %150 : vector<64x128xf32>
    %cst_196 = arith.constant 0.000000e+00 : f32
    %152 = vector.broadcast %cst_196 : f32 to vector<64x128xf32>
    %153 = arith.maximumf %151, %152 : vector<64x128xf32>
    %c0_197 = arith.constant 0 : index
    %c0_198 = arith.constant 0 : index
    %154 = vector.load %arg8[%c0_197, %c0_198] : memref<64x128xf32, #tpu.memory_space<vmem>>, vector<64x128xf32>
    tpu.vector_store %arg8[%c0_197, %c0_198], %153 {strides = array<i32>} : memref<64x128xf32, #tpu.memory_space<vmem>>, vector<64x128xf32>,
    return
  }
  func.func @transform_0(%arg0: i32) -> (i32, i32, i32, i32, i32) {
    %c0_i32 = arith.constant 0 : i32
    %c0_i32_0 = arith.constant 0 : i32
    %c0_i32_1 = arith.constant 0 : i32
    %c0_i32_2 = arith.constant 0 : i32
    %c0_i32_3 = arith.constant 0 : i32
    return %arg0, %c0_i32, %c0_i32_0, %c0_i32_1, %c0_i32_2 : i32, i32, i32, i32, i32
  }
  func.func @transform_1(%arg0: i32) -> (i32, i32, i32) {
    %c0_i32 = arith.constant 0 : i32
    %c0_i32_0 = arith.constant 0 : i32
    %c0_i32_1 = arith.constant 0 : i32
    %c0_i32_2 = arith.constant 0 : i32
    return %c0_i32, %c0_i32_0, %c0_i32_1 : i32, i32, i32
  }
  func.func @transform_2(%arg0: i32) -> (i32, i32) {
    %c0_i32 = arith.constant 0 : i32
    %c0_i32_0 = arith.constant 0 : i32
    %c0_i32_1 = arith.constant 0 : i32
    return %c0_i32, %c0_i32_0 : i32, i32
  }
  func.func @transform_3(%arg0: i32) -> (i32, i32) {
    %c0_i32 = arith.constant 0 : i32
    %c0_i32_0 = arith.constant 0 : i32
    %c0_i32_1 = arith.constant 0 : i32
    return %c0_i32, %c0_i32_0 : i32, i32
  }
  func.func @transform_4(%arg0: i32) -> (i32, i32, i32) {
    %c0_i32 = arith.constant 0 : i32
    %c0_i32_0 = arith.constant 0 : i32
    %c0_i32_1 = arith.constant 0 : i32
    %c0_i32_2 = arith.constant 0 : i32
    return %c0_i32, %c0_i32_0, %c0_i32_1 : i32, i32, i32
  }
  func.func @transform_5(%arg0: i32) -> (i32, i32) {
    %c0_i32 = arith.constant 0 : i32
    %c0_i32_0 = arith.constant 0 : i32
    %c0_i32_1 = arith.constant 0 : i32
    return %c0_i32, %c0_i32_0 : i32, i32
  }
  func.func @transform_6(%arg0: i32) -> (i32, i32) {
    %c0_i32 = arith.constant 0 : i32
    %c0_i32_0 = arith.constant 0 : i32
    %c0_i32_1 = arith.constant 0 : i32
    return %c0_i32, %c0_i32_0 : i32, i32
  }
  func.func @transform_7(%arg0: i32) -> (i32, i32) {
    %c0_i32 = arith.constant 0 : i32
    %c0_i32_0 = arith.constant 0 : i32
    return %arg0, %c0_i32 : i32, i32
  }
}

</mosaic_0001>

<bundles_post_ra>
// kernel: tpu_custom_call.1
= control target key start
LH: loop header
LB: loop body
LE: loop exit
PB: predicated region body
PF: predicated region fallthrough
CT: control target
= control target key end

     0   :  { %s5154_s0 = inlined_call_operand.hbm [shape: f32[2,8,2,8,8], index: 0, kind: input, shape index: {}]   ;;  %s5155_s1 = inlined_call_operand.hbm [shape: f32[9,4,128], index: 1, kind: input, shape index: {}]   ;;  %s5156_s2 = inlined_call_operand.vmem [shape: f32[1,128], index: 2, kind: input, shape index: {}]   ;;  %s5157_s3 = inlined_call_operand.vmem [shape: f32[1,128], index: 3, kind: input, shape index: {}]   ;;  %s5158_s4 = inlined_call_operand.hbm [shape: f32[9,128,128], index: 4, kind: input, shape index: {}]   ;;  %s5159_s5 = inlined_call_operand.vmem [shape: f32[1,128], index: 5, kind: input, shape index: {}]   ;;  %s5160_s6 = inlined_call_operand.vmem [shape: f32[1,128], index: 6, kind: input, shape index: {}]   ;;  %s5161_s7 = inlined_call_operand.hbm [shape: f32[128,128], index: 7, kind: output, shape index: {}]  }
   0x1   :  { %5170 = sst [smem:[#allocation23_spill]] %s5155_s1 }
   0x2   :  { %12 = vsyncpa [#allocation5], 0 }
   0x3   :  { %14 = vsyncpa [#allocation5 + $0x1], 0 }
   0x4   :  { %15 = vsyncpa [#allocation8], 0 }
   0x5   :  { %16 = vsyncpa [#allocation6], 0 }
   0x6   :  { %18 = vsyncpa [#allocation6 + $0x1], 0  ;;  %s4420_s24 = smov 0   ;;  %s4422_s25 = smov 0  }
   0x7   :  { %s4424_s26 = smov 0   ;;  %s4426_s27 = smov 0  }
   0x8 LB: > { %s4441_s28 = sadd.s32 4294967295, %s4366_s27   ;;  %s3216_s29 = sadd.s32 4294967294, %s4366_s27   ;;  %s4366_s27 = sphi %s4426_s27, %s5219_s27   ;;  %s4362_s26 = sphi %s4424_s26, %s5218_s26   ;;  %s4358_s25 = sphi %s4422_s25, %s5217_s25   ;;  %s4354_s24 = sphi %s4420_s24, %s5216_s24  }
   0x9   : > { %p44_p0 = scmp.ne.s32.totalorder %s4358_s25, %s4354_s24  ;;  %p5162_p1 = scmp.eq.s32.totalorder %s4441_s28, 0 }
   0xa   : > { %p200_p3 = scmp.eq.s32.totalorder %s3216_s29, 1  ;;  %p3217_p5 = scmp.ge.s32.totalorder %s4366_s27, 1 }
   0xb   : > { %p4450_p4 = por %p5162_p1, %p44_p0  ;;  %p207_p7 = scmp.lt.s32.totalorder %s4366_s27, 3 }
   0xc   : > { %p4455_p6 = por %p200_p3, %p44_p0  ;;  %s4368_s10 = smov [#allocation7]  }
   0xd   : > { %s5171_s30 = scalar_select %p4450_p4, 1, 0 }
   0xe   : > { %s5172_s8 = scalar_select %p4455_p6, 1, 0 }
   0xf   : > { %p4460_p8 = pnand %p3217_p5, %p207_p7  ;;  %s219_s11 = sshll.u32 %s4368_s10, 4  ;;  %s220_s11 = int_to_ptr.vmem [resolvable:$true] %s219_s11 }
  0x10   : > { %s4369_s13 = smov [#allocation9]   ;;  %s4229_s15 = scalar_lea.vmem %s220_s11, 576 }
  0x11   : > { %s5173_s9 = scalar_select %p4460_p8, 1, 0 }
  0x12   : > { %p4154_p9 = pneg %p4460_p8  ;;  %s238_s14 = sshll.u32 %s4369_s13, 4  ;;  %s239_s14 = int_to_ptr.vmem [resolvable:$true] %s238_s14 }
  0x13   : > { %p4230_p13 = scmp.ne.s32.totalorder %s220_s11, %s4229_s15  ;;  %p4237_p5 = scmp.lt.s32.totalorder %s220_s11, %s220_s11 }
  0x14   : > { %p4469_p11 = pnand %p4154_p9, %p5162_p1  ;;  %p4238_p7 = scmp.lt.s32.totalorder %s4229_s15, %s4229_s15 }
  0x16   : > { %p4220_p12 = pneg %p4469_p11  ;;  %p4239_p10 = por %p4238_p7, %p4237_p5 }
  0x18   : > { %p4232_p0 = pnand %p4230_p13, %p4220_p12 }
  0x1a   : > { %p4233_p3 = pneg %p4232_p0 }
  0x1c   : > { %p4240_p9 = pnand %p4239_p10, %p4233_p3 }
  0x1e   : > { %4243 = shalt.err (!%p4240_p9)
}
  0x1f   : > { %s4370_s16 = smov 64   ;;  %s4371_s17 = smov 4  }
  0x20   : > { %s5175_s1 = sld [smem:[#allocation23_spill]]  ;;  %s4255_s20 = scalar_lea.vmem %s239_s14, 18432 }
  0x21   : > { %p4256_p1 = scmp.ne.s32.totalorder %s239_s14, %s4255_s20  ;;  %p4263_p2 = scmp.lt.s32.totalorder %s239_s14, %s239_s14 }
  0x22   : > { %p4264_p6 = scmp.lt.s32.totalorder %s4255_s20, %s4255_s20 }
  0x23   : > { %p4258_p13 = pnand %p4256_p1, %p4220_p12 }
  0x24   : > { %p4265_p5 = por %p4264_p6, %p4263_p2 }
  0x25   : > { %p4259_p0 = pneg %p4258_p13 }
  0x26   : > { %4157 = dma.hbm_to_vmem [thread:$0]  (!%p4469_p11), %s5175_s1, 576, %s220_s11, [#allocation8], %s4370_s16, %s4370_s16, %s4371_s17  }
  0x27   : > { %p4266_p10 = pnand %p4265_p5, %p4259_p0 }
  0x29   : > { %4269 = shalt.err (!%p4266_p10)
}
  0x2a   : > { %s5163_s21 = smov 128   ;;  %s5164_s22 = smov 8  }
  0x2b   : > { %4160 = dma.hbm_to_vmem [thread:$0]  (!%p4469_p11), %s5158_s4, 18432, %s239_s14, [#allocation8], %s5163_s21, %s5163_s21, %s5164_s22  }
  0x2c   : > { %s4495_s10 = sadd.s32 1, %s4366_s27   ;;  %s31_s13 = sadd.s32 1, %s4362_s26 }
  0x2d   : > { %s28_s11 = ssub.s32 %s4366_s27, %s4495_s10  ;;  %p38_p2 = scmp.ne.s32.totalorder %s4362_s26, %s4358_s25 }
  0x2e   : > { %p29_p1 = scmp.eq.s32.totalorder %s28_s11, 0  ;;  %p39_p6 = scmp.eq.s32.totalorder %s4366_s27, 0 }
  0x2f   : > { %p5176_p3 = scmp.eq.s32.totalorder %s4441_s28, 1  ;;  %p4171_p9 = scmp.lt.s32.totalorder %s4366_s27, 2 }
  0x30   : > { %s4504_s15 = scalar_select %p29_p1, %s4362_s26, %s31_s13  }
  0x31   : > { %p40_p12 = por %p39_p6, %p38_p2  ;;  %p4508_p7 = por %p5176_p3, %p38_p2 }
  0x32   : > { %s258_s16 = sand.u32 1, %s4362_s26   ;;  %s3319_s14 = sshll.u32 %s4366_s27, 11 }
  0x33   : > { %s5177_s12 = scalar_select %p4508_p7, 1, 0 }
  0x34   : > { %s3221_s17 = sshll.u32 %s258_s16, 7  ;;  %s4518_s20 = scalar_lea.hbm %s5154_s0, %s3319_s14 }
  0x35   : > { %s262_s23 = scalar_lea.vmem [#allocation4], %s3221_s17  ;;  %p4522_p11 = pnand %p4171_p9, %p40_p12 }
  0x36   : > { %s269_s29 = sshll.u32 %s262_s23, 4  ;;  %s4526_s13 = scalar_lea.sflag [#allocation5], %s258_s16  ;;  %s4520_s29 = int_to_ptr.vmem [resolvable:$true] %s269_s29 }
  0x37   : > { %s4270_s21 = scalar_lea.hbm %s4518_s20, 2048  ;;  %p4272_p0 = pneg %p4522_p11 }
  0x38   : > { %p4271_p13 = scmp.ne.s32.totalorder %s4518_s20, %s4270_s21  ;;  %s4275_s17 = scalar_lea.hbm %s5154_s0, 4096 }
  0x39   : > { %p4276_p1 = scmp.lt.s32.totalorder %s4518_s20, %s5154_s0  ;;  %p4277_p2 = scmp.lt.s32.totalorder %s4275_s17, %s4270_s21 }
  0x3a   : > { %p4273_p5 = pnand %p4272_p0, %p4271_p13 }
  0x3b   : > { %p4278_p6 = por %p4277_p2, %p4276_p1 }
  0x3c   : > { %p4274_p10 = pneg %p4273_p5 }
  0x3e   : > { %p4279_p12 = pnand %p4278_p6, %p4274_p10 }
  0x40   : > { %4282 = shalt.err (!%p4279_p12)
}
  0x41   : > { %s4283_s16 = scalar_lea.vmem %s4520_s29, 2048  ;;  %s4374_s22 = smov [#allocation4]  }
  0x42   : > { %p4284_p3 = scmp.ne.s32.totalorder %s4520_s29, %s4283_s16  ;;  %s4288_s1 = sshll.u32 %s4374_s22, 4  ;;  %s4289_s1 = int_to_ptr.vmem [resolvable:$false] %s4288_s1 }
  0x43   : > { %s4290_s14 = scalar_lea.vmem %s4289_s1, 4096  ;;  %p4291_p5 = scmp.lt.s32.totalorder %s4520_s29, %s4289_s1 }
  0x44   : > { %p4286_p9 = pnand %p4284_p3, %p4272_p0  ;;  %p4292_p7 = scmp.lt.s32.totalorder %s4290_s14, %s4283_s16 }
  0x46   : > { %p4287_p13 = pneg %p4286_p9  ;;  %p4293_p4 = por %p4292_p7, %p4291_p5 }
  0x48   : > { %p4294_p8 = pnand %p4293_p4, %p4287_p13 }
  0x4a   : > { %4297 = shalt.err (!%p4294_p8)
}
  0x4b   : > { %s5179_s21 = smov 8   ;;  %s5180_s18 = smov 128  }
  0x4c   : > { %4164 = dma.hbm_to_vmem [thread:$0]  (!%p4522_p11), %s4518_s20, 2048, %s4520_s29, %s4526_s13, %s5180_s18, %s5180_s18, %s5179_s21  }
  0x4d   : > { %p5181_p0 = scmp.ne.s32.totalorder %s5173_s9, 0 }
  0x4f   : > { %281 = sbr.rel (%p5181_p0) target bundleno = 880 (0x370), region = 48 }
  0x54   : > { %s4553_s22 = sand.u32 1, %s4358_s25   ;;  %p5182_p4 = scmp.ne.s32.totalorder %s5171_s30, 0 }
  0x55   : > { %s3225_s1 = sshll.u32 %s4553_s22, 7  ;;  %s284_s17 = scalar_lea.sflag [#allocation5], %s4553_s22 }
  0x56   : > { %s4557_s19 = scalar_lea.vmem [#allocation4], %s3225_s1 }
  0x57   : > { %4341 = dma.done.wait (%p5182_p4), %s284_s17, 2048  }
  0x58   : > { %4343 = vsyncadd (%p5182_p4), %s284_s17, 4294965248  ;;  %p5183_p8 = scmp.eq.s32.totalorder %s4441_s28, 0 }
  0x5a   : > { %4345 = dma.done.wait (%p5183_p8), [#allocation8], 19008   ;;  %p5184_p7 = pmov %p5183_p8 }
  0x5b   : > { %vm327_vm0 = vcmask 31744   ;;  %vm330_vm1 = vcmask 24576   ;;  %v4375_v0 = vmov 0.0   ;;  %v383_v1 = vld [vmem:[%s4557_s19] sm:$0xff]  ;;  %v384_v2 = vld [vmem:[%s4557_s19 + $0x8] sm:$0xff]  ;;  %v385_v6 = vld [vmem:[%s4557_s19 + $0x10] sm:$0xff] }
  0x5c   : > { %4347 = vsyncadd (%p5184_p7), [#allocation8], 4294948288  ;;  %329 = vst.msk [vmem:[#allocation2 + $0x8] sm:$0xff] %vm327_vm0, %v4375_v0  ;;  %v387_v3 = vld [vmem:[%s4557_s19 + $0x20] sm:$0xff]  ;;  %v399_v4 = vmax.f32 %v383_v1, %v384_v2  ;;  %v388_v5 = vld [vmem:[%s4557_s19 + $0x28] sm:$0xff]  ;;  %s4376_s30 = smov 124  }
  0x5d   : > { %328 = vst.msk [vmem:[#allocation2] sm:$0xff] %vm327_vm0, %v4375_v0  ;;  %333 = vst.msk [vmem:[#allocation2 + $0xd8] sm:$0xff] %vm327_vm0, %v4375_v0  ;;  %v386_v7 = vld [vmem:[%s4557_s19 + $0x18] sm:$0xff]  ;;  %v401_v8 = vmax.f32 %v387_v3, %v388_v5  ;;  %v389_v9 = vld [vmem:[%s4557_s19 + $0x30] sm:$0xff]  ;;  %vm499_vm2 = vcmask 1043456   ;;  %s3228_s21 = sshll.u32 %s4553_s22, 6 }
  0x5e   : > { %334 = vst.msk [vmem:[#allocation2 + $0xe0] sm:$0xff] %vm327_vm0, %v4375_v0  ;;  %356 = vst [vmem:[#allocation3] sm:$0xff] %v4375_v0  ;;  %v390_v10 = vld [vmem:[%s4557_s19 + $0x38] sm:$0xff]  ;;  %415 = vrot.lane.b32.xlu0 %v399_v4, %s4376_s30  ;;  %v400_v11 = vmax.f32 %v385_v6, %v386_v7  ;;  %v391_v13 = vld [vmem:[%s4557_s19 + $0x40] sm:$0xff]  ;;  %s5083_s18 = scalar_lea.vmem [#allocation10], %s3228_s21  ;;  %s3320_s1 = sshll.u32 %s4441_s28, 10 }
  0x5f   : > { %357 = vst [vmem:[#allocation3 + $0x8] sm:$0xff] %v4375_v0  ;;  %358 = vst [vmem:[#allocation3 + $0x10] sm:$0x1] %v4375_v0  ;;  %419 = vrot.lane.b32.xlu1 %v401_v8, %s4376_s30  ;;  %v402_v12 = vmax.f32 %v389_v9, %v390_v10  ;;  %v392_v14 = vld [vmem:[%s4557_s19 + $0x48] sm:$0xff]  ;;  %v393_v15 = vld [vmem:[%s4557_s19 + $0x50] sm:$0xff]  ;;  %s3124_s17 = sshll.u32 %s5083_s18, 4  ;;  %s5107_s9 = scalar_lea.hbm %s5161_s7, %s3320_s1  ;;  %s5109_s17 = int_to_ptr.vmem [resolvable:$true] %s3124_s17 }
  0x60   : > { %360 = vst [vmem:[#allocation3 + $0xd8] sm:$0xff] %v4375_v0  ;;  %361 = vst [vmem:[#allocation3 + $0xe0] sm:$0xff] %v4375_v0  ;;  %v394_v16 = vld [vmem:[%s4557_s19 + $0x58] sm:$0xff]  ;;  %v474_v17 = vld [vmem:[#allocation7 + $0x4] sm:$0xf]  ;;  %v403_v20 = vmax.f32 %v391_v13, %v392_v14  ;;  %s3111_s20 = scalar_lea.sflag [#allocation6], %s4553_s22 }
  0x61   : > { %362 = vst [vmem:[#allocation3 + $0xe8] sm:$0x1] %v4375_v0  ;;  %364 = vst [vmem:[#allocation3 + $0x1f] sm:$0x1] %v4375_v0  ;;  %3618 = vmatprep.subr.msk.mxu0 %vm499_vm2, %v474_v17  ;;  %v464_v19 = vld [vmem:[#allocation7] sm:$0xf]  ;;  %v404_v21 = vmax.f32 %v393_v15, %v394_v16 }
  0x62   : > { %365 = vst [vmem:[#allocation3 + $0x37] sm:$0x1] %v4375_v0  ;;  %366 = vst [vmem:[#allocation3 + $0x4f] sm:$0x1] %v4375_v0  ;;  %417 = vrot.lane.b32.xlu0 %v400_v11, %s4376_s30  ;;  %3619 = vmatpush3.msk.msra.mxu0 %vm499_vm2, %v474_v17  ;;  %v395_v22 = vld [vmem:[%s4557_s19 + $0x60] sm:$0xff]  ;;  %v396_v23 = vld [vmem:[%s4557_s19 + $0x68] sm:$0xff] }
  0x63   : > { %367 = vst [vmem:[#allocation3 + $0x67] sm:$0x1] %v4375_v0  ;;  %368 = vst [vmem:[#allocation3 + $0x7f] sm:$0x1] %v4375_v0  ;;  %v465_v18 = vld [vmem:[#allocation2 + $0x8] sm:$0xff]  ;;  %421 = vrot.lane.b32.xlu1 %v402_v12, %s4376_s30  ;;  %3632 = vmatprep.subr.msk.mxu0 %vm499_vm2, %v464_v19  ;;  %v397_v24 = vld [vmem:[%s4557_s19 + $0x70] sm:$0xff]  ;;  %v405_v26 = vmax.f32 %v395_v22, %v396_v23 }
  0x64   : > { %369 = vst [vmem:[#allocation3 + $0x97] sm:$0x1] %v4375_v0  ;;  %370 = vst [vmem:[#allocation3 + $0xaf] sm:$0x1] %v4375_v0  ;;  %3620 = vmatprep.mubr.msk.f32.mxu0 %vm327_vm0, %v465_v18  ;;  %v398_v25 = vld [vmem:[%s4557_s19 + $0x78] sm:$0xff]  ;;  %4140 = vmatprep.subr.msk.mxu1 %vm499_vm2, %v464_v19  ;;  %v1884_v18 = vld [vmem:[#allocation9 + $0xe8] sm:$0xff] }
  0x65   : > { %371 = vst [vmem:[#allocation3 + $0xc7] sm:$0x1] %v4375_v0  ;;  %374 = vst [vmem:[#allocation3 + $0x28] sm:$0x1] %v4375_v0  ;;  %4141 = vmatpush3.msk.msra.mxu1 %vm499_vm2, %v464_v19  ;;  %v406_v27 = vmax.f32 %v397_v24, %v398_v25  ;;  %v899_v28 = vld [vmem:[#allocation7 + $0xc] sm:$0xf] }
  0x66   : > { %375 = vst [vmem:[#allocation3 + $0x40] sm:$0x1] %v4375_v0  ;;  %376 = vst [vmem:[#allocation3 + $0x58] sm:$0x1] %v4375_v0  ;;  %423 = vrot.lane.b32.xlu0 %v403_v20, %s4376_s30  ;;  %3660 = vmatprep.subr.msk.mxu1 %vm499_vm2, %v899_v28  ;;  %v749_v42 = vld [vmem:[#allocation7 + $0x8] sm:$0xf] }
  0x67   : > { %377 = vst [vmem:[#allocation3 + $0x70] sm:$0x1] %v4375_v0  ;;  %378 = vst [vmem:[#allocation3 + $0x88] sm:$0x1] %v4375_v0  ;;  %425 = vrot.lane.b32.xlu1 %v404_v21, %s4376_s30  ;;  %v1199_v55 = vld [vmem:[#allocation7 + $0x14] sm:$0xf] }
  0x68   : > { %379 = vst [vmem:[#allocation3 + $0xa0] sm:$0x1] %v4375_v0  ;;  %380 = vst [vmem:[#allocation3 + $0xb8] sm:$0x1] %v4375_v0  ;;  %v1049_v62 = vld [vmem:[#allocation7 + $0x10] sm:$0xf] }
  0x69   : > { %381 = vst [vmem:[#allocation3 + $0xd0] sm:$0x1] %v4375_v0  ;;  %340 = vst.msk [vmem:[#allocation2 + $0x67] sm:$0x1] %vm330_vm1, %v4375_v0  ;;  %v1500_v63 = vld [vmem:[#allocation7 + $0x1c] sm:$0xf] }
  0x6a   : > { %331 = vst.msk [vmem:[#allocation2 + $0x10] sm:$0x1] %vm330_vm1, %v4375_v0  ;;  %335 = vst.msk [vmem:[#allocation2 + $0xe8] sm:$0x1] %vm330_vm1, %v4375_v0  ;;  %427 = vrot.lane.b32.xlu0 %v405_v26, %s4376_s30  ;;  %v1350_v3 = vld [vmem:[#allocation7 + $0x18] sm:$0xf] }
  0x6b   : > { %337 = vst.msk [vmem:[#allocation2 + $0x1f] sm:$0x1] %vm330_vm1, %v4375_v0  ;;  %338 = vst.msk [vmem:[#allocation2 + $0x37] sm:$0x1] %vm330_vm1, %v4375_v0  ;;  %429 = vrot.lane.b32.xlu1 %v406_v27, %s4376_s30  ;;  %v1498_v14 = vld [vmem:[#allocation2 + $0xe0] sm:$0xff]  ;;  %v1885_v17 = vld [vmem:[#allocation9 + $0xf0] sm:$0xff] }
  0x6c   : > { %339 = vst.msk [vmem:[#allocation2 + $0x4f] sm:$0x1] %vm330_vm1, %v4375_v0  ;;  %341 = vst.msk [vmem:[#allocation2 + $0x7f] sm:$0x1] %vm330_vm1, %v4375_v0  ;;  %v1886_v16 = vld [vmem:[#allocation9 + $0xf8] sm:$0xff]  ;;  %v1860_v22 = vld [vmem:[#allocation9 + $0x70] sm:$0xff] }
  0x6d   : > { %342 = vst.msk [vmem:[#allocation2 + $0x97] sm:$0x1] %vm330_vm1, %v4375_v0  ;;  %343 = vst.msk [vmem:[#allocation2 + $0xaf] sm:$0x1] %vm330_vm1, %v4375_v0  ;;  %v1881_v23 = vld [vmem:[#allocation9 + $0xd0] sm:$0xff]  ;;  %v1859_v24 = vld [vmem:[#allocation9 + $0x68] sm:$0xff] }
  0x6e   : > { %344 = vst.msk [vmem:[#allocation2 + $0xc7] sm:$0x1] %vm330_vm1, %v4375_v0  ;;  %347 = vst.msk [vmem:[#allocation2 + $0x28] sm:$0x1] %vm330_vm1, %v4375_v0  ;;  %v1880_v25 = vld [vmem:[#allocation9 + $0xc8] sm:$0xff]  ;;  %s4298_s28 = scalar_lea.vmem %s5109_s17, 1024 }
  0x6f   : > { %348 = vst.msk [vmem:[#allocation2 + $0x40] sm:$0x1] %vm330_vm1, %v4375_v0  ;;  %349 = vst.msk [vmem:[#allocation2 + $0x58] sm:$0x1] %vm330_vm1, %v4375_v0  ;;  %p4299_p11 = scmp.ne.s32.totalorder %s5109_s17, %s4298_s28  ;;  %p5213_p10 = scmp.ne.s32.totalorder %s5177_s12, 0 }
  0x70   : > { %350 = vst.msk [vmem:[#allocation2 + $0x70] sm:$0x1] %vm330_vm1, %v4375_v0  ;;  %351 = vst.msk [vmem:[#allocation2 + $0x88] sm:$0x1] %vm330_vm1, %v4375_v0  ;;  %s4377_s29 = smov [#allocation10]  }
  0x71   : > { %352 = vst.msk [vmem:[#allocation2 + $0xa0] sm:$0x1] %vm330_vm1, %v4375_v0  ;;  %353 = vst.msk [vmem:[#allocation2 + $0xb8] sm:$0x1] %vm330_vm1, %v4375_v0  ;;  %p4300_p1 = pnand %p4299_p11, %p5213_p10  ;;  %s4302_s11 = sshll.u32 %s4377_s29, 4  ;;  %s4303_s11 = int_to_ptr.vmem [resolvable:$false] %s4302_s11 }
  0x72   : > { %354 = vst.msk [vmem:[#allocation2 + $0xd0] sm:$0x1] %vm330_vm1, %v4375_v0  ;;  %363 = vst [vmem:[#allocation3 + $0x7] sm:$0x1] %v4375_v0  ;;  %s4304_s13 = scalar_lea.vmem %s4303_s11, 2048  ;;  %p4305_p6 = scmp.lt.s32.totalorder %s5109_s17, %s4303_s11 }
  0x73   : > { %372 = vst [vmem:[#allocation3 + $0xdf] sm:$0x1] %v4375_v0  ;;  %373 = vst [vmem:[#allocation3 + $0x10] sm:$0x1] %v4375_v0  ;;  %p4301_p2 = pneg %p4300_p1  ;;  %p4306_p12 = scmp.lt.s32.totalorder %s4304_s13, %s4298_s28 }
  0x74   : > { %382 = vst [vmem:[#allocation3 + $0xe8] sm:$0x1] %v4375_v0  ;;  %336 = vst.msk [vmem:[#allocation2 + $0x7] sm:$0x1] %vm330_vm1, %v4375_v0 }
  0x75   : > { %345 = vst.msk [vmem:[#allocation2 + $0xdf] sm:$0x1] %vm330_vm1, %v4375_v0  ;;  %346 = vst.msk [vmem:[#allocation2 + $0x10] sm:$0x1] %vm330_vm1, %v4375_v0  ;;  %p4307_p3 = por %p4306_p12, %p4305_p6 }
  0x76   : > { %355 = vst.msk [vmem:[#allocation2 + $0xe8] sm:$0x1] %vm330_vm1, %v4375_v0 }
  0x77   : > { %p4308_p9 = pnand %p4307_p3, %p4301_p2 }
  0x7b   : > { %v456_v58 = vld [vmem:[#allocation2 + $0x7] sm:$0xff] }
  0x7c   : > { %v740_v1 = vld [vmem:[#allocation2 + $0x9] sm:$0xff]  ;;  %v1348_v15 = vld [vmem:[#allocation2 + $0xdf] sm:$0xff] }
  0xd0   : > { %v416_v29 = vpop.permute.xlu0 %415 }
  0xd1   : > { %v439_v30 = vmax.f32 %v399_v4, %v416_v29  ;;  %v420_v31 = vpop.permute.xlu1 %419  ;;  %v1878_v29 = vld [vmem:[#allocation9 + $0xb8] sm:$0xff] }
  0xd2   : > { %v441_v32 = vmax.f32 %v401_v8, %v420_v31  ;;  %v1877_v31 = vld [vmem:[#allocation9 + $0xb0] sm:$0xff] }
  0xd3   : > { %448 = vst.msk [vmem:[#allocation2 + $0x20] sm:$0xff] %vm327_vm0, %v439_v30  ;;  %v1856_v30 = vld [vmem:[#allocation9 + $0x50] sm:$0xff] }
  0xd4   : > { %450 = vst.msk [vmem:[#allocation2 + $0x50] sm:$0xff] %vm327_vm0, %v441_v32  ;;  %v418_v33 = vpop.permute.xlu0 %417  ;;  %v1855_v32 = vld [vmem:[#allocation9 + $0x48] sm:$0xff] }
  0xd5   : > { %v440_v34 = vmax.f32 %v400_v11, %v418_v33  ;;  %v422_v35 = vpop.permute.xlu1 %421  ;;  %v1650_v11 = vld [vmem:[#allocation7 + $0x20] sm:$0xf]  ;;  %v1876_v33 = vld [vmem:[#allocation9 + $0xa8] sm:$0xff] }
  0xd6   : > { %v442_v36 = vmax.f32 %v402_v12, %v422_v35  ;;  %v1875_v35 = vld [vmem:[#allocation9 + $0xa0] sm:$0xff] }
  0xd7   : > { %449 = vst.msk [vmem:[#allocation2 + $0x38] sm:$0xff] %vm327_vm0, %v440_v34  ;;  %v1854_v34 = vld [vmem:[#allocation9 + $0x40] sm:$0xff] }
  0xd8   : > { %451 = vst.msk [vmem:[#allocation2 + $0x68] sm:$0xff] %vm327_vm0, %v442_v36  ;;  %v424_v37 = vpop.permute.xlu0 %423  ;;  %v1853_v36 = vld [vmem:[#allocation9 + $0x38] sm:$0xff] }
  0xd9   : > { %v443_v38 = vmax.f32 %v403_v20, %v424_v37  ;;  %v426_v39 = vpop.permute.xlu1 %425  ;;  %v1861_v20 = vld [vmem:[#allocation9 + $0x78] sm:$0xff] }
  0xda   : > { %v444_v40 = vmax.f32 %v404_v21, %v426_v39  ;;  %v4680_v41 = vld [vmem:[#allocation2 + $0x20] sm:$0xff]  ;;  %v1873_v39 = vld [vmem:[#allocation9 + $0x90] sm:$0xff] }
  0xdb   : > { %452 = vst.msk [vmem:[#allocation2 + $0x80] sm:$0xff] %vm327_vm0, %v443_v38  ;;  %3621 = vmatmul.mubr.msk.f32.vlgmr.msra.gmra.mxu0 %vm327_vm0, %v4680_v41  ;;  %v4687_v45 = vld [vmem:[#allocation2 + $0x50] sm:$0xff]  ;;  %v890_v59 = vld [vmem:[#allocation2 + $0x1f] sm:$0xff] }
  0xdc   : > { %453 = vst.msk [vmem:[#allocation2 + $0x98] sm:$0xff] %vm327_vm0, %v444_v40  ;;  %v428_v43 = vpop.permute.xlu0 %427  ;;  %3633 = vmatpush3.msk.msra.mxu0 %vm499_vm2, %v464_v19  ;;  %v4738_v61 = vld [vmem:[#allocation2 + $0x4f] sm:$0xff]  ;;  %v741_v2 = vld [vmem:[#allocation2 + $0x21] sm:$0xff] }
  0xdd   : > { %v445_v44 = vmax.f32 %v405_v26, %v428_v43  ;;  %3646 = vmatprep.subr.msk.mxu0 %vm499_vm2, %v749_v42  ;;  %v430_v46 = vpop.permute.xlu1 %429  ;;  %v743_v6 = vld [vmem:[#allocation2 + $0x51] sm:$0xff]  ;;  %v1883_v19 = vld [vmem:[#allocation9 + $0xe0] sm:$0xff]  ;;  %v1882_v21 = vld [vmem:[#allocation9 + $0xd8] sm:$0xff] }
  0xde   : > { %v4690_v47 = vld [vmem:[#allocation2 + $0x38] sm:$0xff]  ;;  %v446_v48 = vmax.f32 %v406_v27, %v430_v46  ;;  %v1858_v26 = vld [vmem:[#allocation9 + $0x60] sm:$0xff]  ;;  %v1851_v40 = vld [vmem:[#allocation9 + $0x28] sm:$0xff] }
  0xdf   : > { %454 = vst.msk [vmem:[#allocation2 + $0xb0] sm:$0xff] %vm327_vm0, %v445_v44  ;;  %3623 = vmatprep.mubr.msk.f32.mxu0 %vm327_vm0, %v4690_v47  ;;  %v4695_v49 = vld [vmem:[#allocation2 + $0x67] sm:$0xff]  ;;  %v4734_v60 = vld [vmem:[#allocation2 + $0x37] sm:$0xff] }
  0xe0   : > { %v4697_v50 = vld [vmem:[#allocation2 + $0x68] sm:$0xff]  ;;  %3624 = vmatmul.mubr.msk.f32.gmra.mxu0 %vm327_vm0, %v4687_v45  ;;  %3640 = vmatprep.mubr.msk.f32.mxu1 %vm327_vm0, %v4695_v49  ;;  %455 = vst.msk [vmem:[#allocation2 + $0xc8] sm:$0xff] %vm327_vm0, %v446_v48  ;;  %v742_v4 = vld [vmem:[#allocation2 + $0x39] sm:$0xff] }
  0xe1   : > { %3626 = vmatprep.mubr.msk.f32.mxu0 %vm327_vm0, %v4697_v50  ;;  %v744_v7 = vld [vmem:[#allocation2 + $0x69] sm:$0xff]  ;;  %v1874_v37 = vld [vmem:[#allocation9 + $0x98] sm:$0xff]  ;;  %v1852_v38 = vld [vmem:[#allocation9 + $0x30] sm:$0xff] }
  0xe2   : > { %v4706_v51 = vld [vmem:[#allocation2 + $0x7f] sm:$0xff]  ;;  %v1848_v46 = vld [vmem:[#allocation9 + $0x10] sm:$0xff] }
  0xe3   : > { %v4708_v52 = vld [vmem:[#allocation2 + $0x80] sm:$0xff]  ;;  %3641 = vmatmul.mubr.msk.f32.vlgmr.msra.gmra.mxu1 %vm327_vm0, %v4706_v51  ;;  %v4712_v53 = vld [vmem:[#allocation2 + $0x97] sm:$0xff] }
  0xe4   : > { %v4714_v54 = vld [vmem:[#allocation2 + $0x98] sm:$0xff]  ;;  %3627 = vmatmul.mubr.msk.f32.gmra.mxu0 %vm327_vm0, %v4708_v52  ;;  %3643 = vmatprep.mubr.msk.f32.mxu1 %vm327_vm0, %v4712_v53  ;;  %v745_v8 = vld [vmem:[#allocation2 + $0x81] sm:$0xff] }
  0xe5   : > { %3629 = vmatprep.mubr.msk.f32.mxu0 %vm327_vm0, %v4714_v54  ;;  %3661 = vmatpush3.msk.msra.mxu1 %vm499_vm2, %v899_v28  ;;  %v746_v9 = vld [vmem:[#allocation2 + $0x99] sm:$0xff]  ;;  %v1879_v27 = vld [vmem:[#allocation9 + $0xc0] sm:$0xff] }
  0xe6   : > { %v4723_v56 = vld [vmem:[#allocation2 + $0xaf] sm:$0xff]  ;;  %3688 = vmatprep.subr.msk.mxu1 %vm499_vm2, %v1199_v55  ;;  %v1857_v28 = vld [vmem:[#allocation9 + $0x58] sm:$0xff]  ;;  %v1871_v43 = vld [vmem:[#allocation9 + $0x80] sm:$0xff] }
  0xe7   : > { %v4725_v57 = vld [vmem:[#allocation2 + $0xb0] sm:$0xff]  ;;  %3644 = vmatmul.mubr.msk.f32.gmra.mxu1 %vm327_vm0, %v4723_v56  ;;  %v897_v5 = vld [vmem:[#allocation2 + $0xc7] sm:$0xff]  ;;  %v1849_v44 = vld [vmem:[#allocation9 + $0x18] sm:$0xff] }
  0xe8   : > { %3630 = vmatmul.mubr.msk.f32.gmra.mxu0 %vm327_vm0, %v4725_v57  ;;  %3662 = vmatprep.mubr.msk.f32.mxu1 %vm327_vm0, %v890_v59  ;;  %v747_v10 = vld [vmem:[#allocation2 + $0xb1] sm:$0xff]  ;;  %v1197_v12 = vld [vmem:[#allocation2 + $0xc9] sm:$0xff] }
  0xe9   : > { %3634 = vmatprep.mubr.msk.f32.mxu0 %vm327_vm0, %v456_v58  ;;  %v1047_v13 = vld [vmem:[#allocation2 + $0xc8] sm:$0xff] }
  0xea   : > { %v1846_v48 = vld [vmem:[#allocation9] sm:$0xff] }
  0xeb   : > { %3663 = vmatmul.mubr.msk.f32.vlgmr.msra.gmra.mxu1 %vm327_vm0, %v4734_v60 }
  0xec   : > { %3635 = vmatmul.mubr.msk.f32.vlgmr.msra.gmra.mxu0 %vm327_vm0, %v890_v59  ;;  %3665 = vmatprep.mubr.msk.f32.mxu1 %vm327_vm0, %v4738_v61 }
  0xed   : > { %3647 = vmatpush3.msk.msra.mxu0 %vm499_vm2, %v749_v42  ;;  %3637 = vmatprep.mubr.msk.f32.mxu0 %vm327_vm0, %v4734_v60  ;;  %v1850_v42 = vld [vmem:[#allocation9 + $0x20] sm:$0xff] }
  0xee   : > { %3674 = vmatprep.subr.msk.mxu0 %vm499_vm2, %v1049_v62  ;;  %3689 = vmatpush3.msk.msra.mxu1 %vm499_vm2, %v1199_v55 }
  0xef   : > { %3666 = vmatmul.mubr.msk.f32.gmra.mxu1 %vm327_vm0, %v4695_v49  ;;  %3716 = vmatprep.subr.msk.mxu1 %vm499_vm2, %v1500_v63 }
  0xf0   : > { %3638 = vmatmul.mubr.msk.f32.gmra.mxu0 %vm327_vm0, %v4738_v61  ;;  %3668 = vmatprep.mubr.msk.f32.mxu1 %vm327_vm0, %v4706_v51 }
  0xf1   : > { %3648 = vmatprep.mubr.msk.f32.mxu0 %vm327_vm0, %v740_v1 }
  0xf3   : > { %3669 = vmatmul.mubr.msk.f32.gmra.mxu1 %vm327_vm0, %v4712_v53 }
  0xf4   : > { %3649 = vmatmul.mubr.msk.f32.vlgmr.msra.gmra.mxu0 %vm327_vm0, %v741_v2  ;;  %3671 = vmatprep.mubr.msk.f32.mxu1 %vm327_vm0, %v4723_v56 }
  0xf5   : > { %3675 = vmatpush3.msk.msra.mxu0 %vm499_vm2, %v1049_v62  ;;  %3651 = vmatprep.mubr.msk.f32.mxu0 %vm327_vm0, %v742_v4 }
  0xf6   : > { %3702 = vmatprep.subr.msk.mxu0 %vm499_vm2, %v1350_v3 }
  0xf7   : > { %3672 = vmatmul.mubr.msk.f32.gmra.mxu1 %vm327_vm0, %v897_v5 }
  0xf8   : > { %3652 = vmatmul.mubr.msk.f32.gmra.mxu0 %vm327_vm0, %v743_v6  ;;  %3690 = vmatprep.mubr.msk.f32.mxu1 %vm327_vm0, %v741_v2 }
  0xf9   : > { %3654 = vmatprep.mubr.msk.f32.mxu0 %vm327_vm0, %v744_v7 }
  0xfb   : > { %3691 = vmatmul.mubr.msk.f32.vlgmr.msra.gmra.mxu1 %vm327_vm0, %v742_v4 }
  0xfc   : > { %3655 = vmatmul.mubr.msk.f32.gmra.mxu0 %vm327_vm0, %v745_v8  ;;  %3693 = vmatprep.mubr.msk.f32.mxu1 %vm327_vm0, %v743_v6 }
  0xfd   : > { %3657 = vmatprep.mubr.msk.f32.mxu0 %vm327_vm0, %v746_v9  ;;  %3717 = vmatpush3.msk.msra.mxu1 %vm499_vm2, %v1500_v63 }
  0xfe   : > { %3744 = vmatprep.subr.mxu1 %v1886_v16 }
  0xff   : > { %3694 = vmatmul.mubr.msk.f32.gmra.mxu1 %vm327_vm0, %v744_v7 }
 0x100   : > { %3658 = vmatmul.mubr.msk.f32.gmra.mxu0 %vm327_vm0, %v747_v10  ;;  %3696 = vmatprep.mubr.msk.f32.mxu1 %vm327_vm0, %v745_v8 }
 0x101   : > { %3676 = vmatprep.mubr.msk.f32.mxu0 %vm327_vm0, %v4680_v41  ;;  %v1872_v41 = vld [vmem:[#allocation9 + $0x88] sm:$0xff] }
 0x103   : > { %3697 = vmatmul.mubr.msk.f32.gmra.mxu1 %vm327_vm0, %v746_v9 }
 0x104   : > { %3677 = vmatmul.mubr.msk.f32.vlgmr.msra.gmra.mxu0 %vm327_vm0, %v4690_v47  ;;  %3699 = vmatprep.mubr.msk.f32.mxu1 %vm327_vm0, %v747_v10 }
 0x105   : > { %3703 = vmatpush3.msk.msra.mxu0 %vm499_vm2, %v1350_v3  ;;  %3679 = vmatprep.mubr.msk.f32.mxu0 %vm327_vm0, %v4687_v45 }
 0x106   : > { %3730 = vmatprep.subr.msk.mxu0 %vm499_vm2, %v1650_v11 }
 0x107   : > { %3700 = vmatmul.mubr.msk.f32.gmra.mxu1 %vm327_vm0, %v1197_v12 }
 0x108   : > { %3680 = vmatmul.mubr.msk.f32.gmra.mxu0 %vm327_vm0, %v4697_v50  ;;  %3718 = vmatprep.mubr.msk.f32.mxu1 %vm327_vm0, %v4690_v47  ;;  %v1847_v47 = vld [vmem:[#allocation9 + $0x8] sm:$0xff] }
 0x109   : > { %3682 = vmatprep.mubr.msk.f32.mxu0 %vm327_vm0, %v4708_v52 }
 0x10b   : > { %3719 = vmatmul.mubr.msk.f32.vlgmr.msra.gmra.mxu1 %vm327_vm0, %v4687_v45  ;;  %v4834_v45 = vld [vmem:[#allocation9 + $0x178] sm:$0xff] }
 0x10c   : > { %3683 = vmatmul.mubr.msk.f32.gmra.mxu0 %vm327_vm0, %v4714_v54  ;;  %3721 = vmatprep.mubr.msk.f32.mxu1 %vm327_vm0, %v4697_v50  ;;  %5185 = vst [vmem:[#allocation14_spill] sm:$0xff] %v4834_v45  ;;  %v4837_v50 = vld [vmem:[#allocation9 + $0x1f8] sm:$0xff] }
 0x10d   : > { %3685 = vmatprep.mubr.msk.f32.mxu0 %vm327_vm0, %v4725_v57  ;;  %3745 = vmatpush3.msra.mxu1 %v1886_v16  ;;  %5186 = vst [vmem:[#allocation15_spill] sm:$0xff] %v4837_v50 }
 0x10e   : > { %3746 = vmatprep.subr.mxu1 %v1885_v17 }
 0x10f   : > { %3722 = vmatmul.mubr.msk.f32.gmra.mxu1 %vm327_vm0, %v4708_v52 }
 0x110   : > { %3686 = vmatmul.mubr.msk.f32.gmra.mxu0 %vm327_vm0, %v1047_v13  ;;  %3724 = vmatprep.mubr.msk.f32.mxu1 %vm327_vm0, %v4714_v54 }
 0x111   : > { %3704 = vmatprep.mubr.msk.f32.mxu0 %vm327_vm0, %v4734_v60  ;;  %3747 = vmatpush3.msra.mxu1 %v1885_v17 }
 0x112   : > { %3748 = vmatprep.subr.mxu1 %v1884_v18 }
 0x113   : > { %3725 = vmatmul.mubr.msk.f32.gmra.mxu1 %vm327_vm0, %v4725_v57 }
 0x114   : > { %3705 = vmatmul.mubr.msk.f32.vlgmr.msra.gmra.mxu0 %vm327_vm0, %v4738_v61  ;;  %3727 = vmatprep.mubr.msk.f32.mxu1 %vm327_vm0, %v1047_v13 }
 0x115   : > { %3731 = vmatpush3.msk.msra.mxu0 %vm499_vm2, %v1650_v11  ;;  %3707 = vmatprep.mubr.msk.f32.mxu0 %vm327_vm0, %v4695_v49  ;;  %v1838_v49 = vld [vmem:[#allocation3 + $0x7] sm:$0xff] }
 0x116   : > { %3749 = vmatpush3.msra.mxu1 %v1884_v18  ;;  %3788 = vmatprep.subr.mxu0 %v1861_v20 }
 0x117   : > { %3728 = vmatmul.mubr.msk.f32.gmra.mxu1 %vm327_vm0, %v1498_v14  ;;  %3750 = vmatprep.subr.mxu1 %v1883_v19 }
 0x118   : > { %3708 = vmatmul.mubr.msk.f32.gmra.mxu0 %vm327_vm0, %v4706_v51  ;;  %3776 = vmatprep.mubr.f32.mxu1 %v4375_v0  ;;  %v1648_v0 = vld [vmem:[#allocation2 + $0xe1] sm:$0xff] }
 0x119   : > { %3710 = vmatprep.mubr.msk.f32.mxu0 %vm327_vm0, %v4712_v53  ;;  %3751 = vmatpush3.msra.mxu1 %v1883_v19 }
 0x11a   : > { %3752 = vmatprep.subr.mxu1 %v1882_v21 }
 0x11b   : > { %3753 = vmatpush3.msra.mxu1 %v1882_v21 }
 0x11c   : > { %3711 = vmatmul.mubr.msk.f32.gmra.mxu0 %vm327_vm0, %v4723_v56  ;;  %3754 = vmatprep.subr.mxu1 %v1881_v23 }
 0x11d   : > { %3713 = vmatprep.mubr.msk.f32.mxu0 %vm327_vm0, %v897_v5  ;;  %3755 = vmatpush3.msra.mxu1 %v1881_v23 }
 0x11e   : > { %3756 = vmatprep.subr.mxu1 %v1880_v25 }
 0x11f   : > { %3757 = vmatpush3.msra.mxu1 %v1880_v25 }
 0x120   : > { %3714 = vmatmul.mubr.msk.f32.gmra.mxu0 %vm327_vm0, %v1348_v15  ;;  %3758 = vmatprep.subr.mxu1 %v1879_v27 }
 0x121   : > { %3732 = vmatprep.mubr.msk.f32.mxu0 %vm327_vm0, %v742_v4  ;;  %3759 = vmatpush3.msra.mxu1 %v1879_v27 }
 0x122   : > { %3760 = vmatprep.subr.mxu1 %v1878_v29 }
 0x123   : > { %3761 = vmatpush3.msra.mxu1 %v1878_v29 }
 0x124   : > { %3733 = vmatmul.mubr.msk.f32.vlgmr.msra.gmra.mxu0 %vm327_vm0, %v743_v6  ;;  %3762 = vmatprep.subr.mxu1 %v1877_v31 }
 0x125   : > { %3735 = vmatprep.mubr.msk.f32.mxu0 %vm327_vm0, %v744_v7  ;;  %3789 = vmatpush3.msra.mxu0 %v1861_v20 }
 0x126   : > { %3790 = vmatprep.subr.mxu0 %v1860_v22  ;;  %3763 = vmatpush3.msra.mxu1 %v1877_v31 }
 0x127   : > { %3791 = vmatpush3.msra.mxu0 %v1860_v22  ;;  %3764 = vmatprep.subr.mxu1 %v1876_v33 }
 0x128   : > { %3736 = vmatmul.mubr.msk.f32.gmra.mxu0 %vm327_vm0, %v745_v8  ;;  %3792 = vmatprep.subr.mxu0 %v1859_v24 }
 0x129   : > { %3738 = vmatprep.mubr.msk.f32.mxu0 %vm327_vm0, %v746_v9  ;;  %3793 = vmatpush3.msra.mxu0 %v1859_v24 }
 0x12a   : > { %3794 = vmatprep.subr.mxu0 %v1858_v26  ;;  %3765 = vmatpush3.msra.mxu1 %v1876_v33 }
 0x12b   : > { %3795 = vmatpush3.msra.mxu0 %v1858_v26  ;;  %3766 = vmatprep.subr.mxu1 %v1875_v35 }
 0x12c   : > { %3739 = vmatmul.mubr.msk.f32.gmra.mxu0 %vm327_vm0, %v747_v10  ;;  %3796 = vmatprep.subr.mxu0 %v1857_v28 }
 0x12d   : > { %3741 = vmatprep.mubr.msk.f32.mxu0 %vm327_vm0, %v1197_v12  ;;  %3797 = vmatpush3.msra.mxu0 %v1857_v28 }
 0x12e   : > { %3798 = vmatprep.subr.mxu0 %v1856_v30  ;;  %3767 = vmatpush3.msra.mxu1 %v1875_v35 }
 0x12f   : > { %3799 = vmatpush3.msra.mxu0 %v1856_v30  ;;  %3768 = vmatprep.subr.mxu1 %v1874_v37 }
 0x130   : > { %3742 = vmatmul.mubr.msk.f32.gmra.mxu0 %vm327_vm0, %v1648_v0  ;;  %3800 = vmatprep.subr.mxu0 %v1855_v32 }
 0x131   : > { %3801 = vmatpush3.msra.mxu0 %v1855_v32  ;;  %3769 = vmatpush3.msra.mxu1 %v1874_v37 }
 0x132   : > { %3802 = vmatprep.subr.mxu0 %v1854_v34  ;;  %3770 = vmatprep.subr.mxu1 %v1873_v39 }
 0x133   : > { %3803 = vmatpush3.msra.mxu0 %v1854_v34  ;;  %3771 = vmatpush3.msra.mxu1 %v1873_v39 }
 0x134   : > { %3804 = vmatprep.subr.mxu0 %v1853_v36  ;;  %3772 = vmatprep.subr.mxu1 %v1872_v41 }
 0x135   : > { %3805 = vmatpush3.msra.mxu0 %v1853_v36  ;;  %3773 = vmatpush3.msra.mxu1 %v1872_v41 }
 0x136   : > { %3806 = vmatprep.subr.mxu0 %v1852_v38  ;;  %3774 = vmatprep.subr.mxu1 %v1871_v43 }
 0x137   : > { %3807 = vmatpush3.msra.mxu0 %v1852_v38  ;;  %3775 = vmatpush3.msra.mxu1 %v1871_v43 }
 0x138   : > { %3808 = vmatprep.subr.mxu0 %v1851_v40  ;;  %3832 = vmatprep.subr.mxu1 %v4834_v45 }
 0x139   : > { %3809 = vmatpush3.msra.mxu0 %v1851_v40  ;;  %3820 = vmatprep.mubr.f32.mxu0 %v1838_v49 }
 0x13a   : > { %3810 = vmatprep.subr.mxu0 %v1850_v42 }
 0x13b   : > { %3811 = vmatpush3.msra.mxu0 %v1850_v42 }
 0x13c   : > { %3812 = vmatprep.subr.mxu0 %v1849_v44 }
 0x13d   : > { %3813 = vmatpush3.msra.mxu0 %v1849_v44 }
 0x13e   : > { %3814 = vmatprep.subr.mxu0 %v1848_v46 }
 0x13f   : > { %3815 = vmatpush3.msra.mxu0 %v1848_v46 }
 0x140   : > { %3816 = vmatprep.subr.mxu0 %v1847_v47 }
 0x141   : > { %3817 = vmatpush3.msra.mxu0 %v1847_v47 }
 0x142   : > { %3818 = vmatprep.subr.mxu0 %v1846_v48 }
 0x143   : > { %3819 = vmatpush3.msra.mxu0 %v1846_v48 }
 0x144   : > { %3876 = vmatprep.subr.mxu0 %v4837_v50 }
 0x19b   : > { %v3622_v51 = vpop.f32.mrf.mxu0 }
 0x19d   : > { %v569_v52 = vpop.f32.mrf.mxu0 }
 0x1a0   : > { %v3625_v53 = vpop.f32.mrf.mxu0 }
 0x1a2   : > { %v579_v54 = vpop.f32.mrf.mxu0 }
 0x1a3   : > { %v3642_v55 = vpop.f32.mrf.mxu1 }
 0x1a4   : > { %v3628_v56 = vpop.f32.mrf.mxu0 }
 0x1a5   : > { %v721_v57 = vpop.f32.mrf.mxu1  ;;  %v727_v48 = vadd.f32 %v3642_v55, %v3628_v56 }
 0x1a6   : > { %v589_v58 = vpop.f32.mrf.mxu0 }
 0x1a7   : > { %v4840_v59 = vpop.f32.mrf.mxu1 }
 0x1a8   : > { %v3631_v60 = vpop.f32.mrf.mxu0 }
 0x1a9   : > { %v4842_v61 = vpop.f32.mrf.mxu1 }
 0x1aa   : > { %v4844_v62 = vpop.f32.mrf.mxu0 }
 0x1ab   : > { %v3664_v63 = vpop.f32.mrf.mxu1  ;;  %v732_v55 = vadd.f32 %v4842_v61, %v4844_v62 }
 0x1ac   : > { %v3636_v1 = vpop.f32.mrf.mxu0 }
 0x1ad   : > { %v993_v2 = vpop.f32.mrf.mxu1  ;;  %v707_v34 = vadd.f32 %v3636_v1, %v3622_v51 }
 0x1ae   : > { %v701_v3 = vpop.f32.mrf.mxu0 }
 0x1af   : > { %v3667_v4 = vpop.f32.mrf.mxu1  ;;  %v702_v36 = vadd.f32 %v701_v3, %v569_v52 }
 0x1b0   : > { %v3639_v5 = vpop.f32.mrf.mxu0 }
 0x1b1   : > { %v1003_v6 = vpop.f32.mrf.mxu1  ;;  %v717_v40 = vadd.f32 %v3639_v5, %v3625_v53 }
 0x1b2   : > { %v711_v7 = vpop.f32.mrf.mxu0 }
 0x1b3   : > { %v3670_v8 = vpop.f32.mrf.mxu1  ;;  %v712_v43 = vadd.f32 %v711_v7, %v579_v54 }
 0x1b4   : > { %v3650_v9 = vpop.f32.mrf.mxu0 }
 0x1b5   : > { %v4846_v10 = vpop.f32.mrf.mxu1  ;;  %v883_v37 = vadd.f32 %v3650_v9, %v707_v34  ;;  %v737_v9 = vadd.f32 %v4840_v59, %v3631_v60 }
 0x1b6   : > { %v843_v11 = vpop.f32.mrf.mxu0 }
 0x1b7   : > { %v4848_v12 = vpop.f32.mrf.mxu1  ;;  %v882_v41 = vadd.f32 %v843_v11, %v702_v36  ;;  %v1033_v46 = vadd.f32 %v3664_v63, %v883_v37 }
 0x1b8   : > { %v3653_v13 = vpop.f32.mrf.mxu0 }
 0x1b9   : > { %v4850_v14 = vpop.f32.mrf.mxu1  ;;  %v885_v44 = vadd.f32 %v3653_v13, %v717_v40 }
 0x1ba   : > { %v853_v15 = vpop.f32.mrf.mxu0 }
 0x1bb   : > { %v3692_v0 = vpop.f32.mrf.mxu1  ;;  %v884_v50 = vadd.f32 %v853_v15, %v712_v43  ;;  %v1035_v52 = vadd.f32 %v3667_v4, %v885_v44 }
 0x1bc   : > { %v3656_v16 = vpop.f32.mrf.mxu0 }
 0x1bd   : > { %v1293_v17 = vpop.f32.mrf.mxu1  ;;  %v1034_v54 = vadd.f32 %v1003_v6, %v884_v50 }
 0x1be   : > { %v863_v18 = vpop.f32.mrf.mxu0 }
 0x1bf   : > { %v3695_v19 = vpop.f32.mrf.mxu1 }
 0x1c0   : > { %v3659_v20 = vpop.f32.mrf.mxu0 }
 0x1c1   : > { %v1303_v21 = vpop.f32.mrf.mxu1  ;;  %v889_v56 = vadd.f32 %v3659_v20, %v737_v9 }
 0x1c2   : > { %v873_v22 = vpop.f32.mrf.mxu0 }
 0x1c3   : > { %v4852_v23 = vpop.f32.mrf.mxu1 }
 0x1c4   : > { %v3678_v24 = vpop.f32.mrf.mxu0 }
 0x1c5   : > { %v4854_v26 = vpop.f32.mrf.mxu1  ;;  %v1183_v45 = vadd.f32 %v3678_v24, %v1033_v46 }
 0x1c6   : > { %v1143_v25 = vpop.f32.mrf.mxu0  ;;  %5187 = vst [vmem:[#allocation16_spill] sm:$0xff] %v4854_v26  ;;  %v887_v26 = vadd.f32 %v3656_v16, %v727_v48  ;;  %v888_v16 = vadd.f32 %v873_v22, %v732_v55 }
 0x1c7   : > { %v4856_v29 = vpop.f32.mrf.mxu1  ;;  %v1333_v7 = vadd.f32 %v3692_v0, %v1183_v45  ;;  %v1039_v45 = vadd.f32 %v4848_v12, %v889_v56 }
 0x1c8   : > { %v3681_v27 = vpop.f32.mrf.mxu0  ;;  %5188 = vst [vmem:[#allocation17_spill] sm:$0xff] %v4856_v29  ;;  %v1032_v29 = vadd.f32 %v993_v2, %v882_v41  ;;  %v1037_v63 = vadd.f32 %v3670_v8, %v887_v26  ;;  %v1038_v20 = vadd.f32 %v4850_v14, %v888_v16 }
 0x1c9   : > { %v4858_v32 = vpop.f32.mrf.mxu1  ;;  %v1185_v11 = vadd.f32 %v3681_v27, %v1035_v52 }
 0x1ca   : > { %v1153_v28 = vpop.f32.mrf.mxu0  ;;  %5189 = vst [vmem:[#allocation18_spill] sm:$0xff] %v4858_v32  ;;  %v722_v32 = vadd.f32 %v721_v57, %v589_v58  ;;  %v1182_v1 = vadd.f32 %v1143_v25, %v1032_v29 }
 0x1cb   : > { %v3720_v38 = vpop.f32.mrf.mxu1  ;;  %v1184_v2 = vadd.f32 %v1153_v28, %v1034_v54 }
 0x1cc   : > { %v3684_v30 = vpop.f32.mrf.mxu0  ;;  %v886_v53 = vadd.f32 %v863_v18, %v722_v32  ;;  %v1332_v15 = vadd.f32 %v1293_v17, %v1182_v1  ;;  %v1335_v18 = vadd.f32 %v3695_v19, %v1185_v11 }
 0x1cd   : > { %v1594_v47 = vpop.f32.mrf.mxu1  ;;  %v1187_v4 = vadd.f32 %v3684_v30, %v1037_v63  ;;  %v1334_v62 = vadd.f32 %v1303_v21, %v1184_v2  ;;  %v5190_v29 = vld [vmem:[#allocation16_spill] sm:$0xff]  ;;  %v4876_v21 = vld [vmem:[%s5157_s3] ss:$0 sm:$0xff] }
 0x1ce   : > { %v1163_v31 = vpop.f32.mrf.mxu0  ;;  %v1036_v24 = vadd.f32 %v4846_v10, %v886_v53  ;;  %v4870_v10 = vld [vmem:[%s5156_s2] ss:$0 sm:$0xff] }
 0x1cf   : > { %v3723_v3 = vpop.f32.mrf.mxu1  ;;  %v1337_v17 = vadd.f32 %v4852_v23, %v1187_v4  ;;  %v5191_v36 = vld [vmem:[#allocation17_spill] sm:$0xff] }
 0x1d0   : > { %v3687_v33 = vpop.f32.mrf.mxu0  ;;  %v1186_v25 = vadd.f32 %v1163_v31, %v1036_v24  ;;  %v5193_v24 = vld [vmem:[#allocation14_spill] sm:$0xff] }
 0x1d1   : > { %v1604_v57 = vpop.f32.mrf.mxu1  ;;  %v1189_v0 = vadd.f32 %v3687_v33, %v1039_v45  ;;  %v5192_v44 = vld [vmem:[#allocation18_spill] sm:$0xff] }
 0x1d2   : > { %v1173_v35 = vpop.f32.mrf.mxu0  ;;  %v1336_v30 = vadd.f32 %v5190_v29, %v1186_v25 }
 0x1d3   : > { %v3726_v6 = vpop.f32.mrf.mxu1  ;;  %v1188_v12 = vadd.f32 %v1173_v35, %v1038_v20  ;;  %v1339_v37 = vadd.f32 %v5191_v36, %v1189_v0  ;;  %v2117_v20 = vld [vmem:[#allocation9 + $0x158] sm:$0xff]  ;;  %v2254_v36 = vld [vmem:[#allocation9 + $0x1d0] sm:$0xff] }
 0x1d4   : > { %v3706_v39 = vpop.f32.mrf.mxu0 }
 0x1d5   : > { %v1484_v58 = vadd.f32 %v3706_v39, %v1333_v7  ;;  %v1614_v23 = vpop.f32.mrf.mxu1  ;;  %v1338_v46 = vadd.f32 %v5192_v44, %v1188_v12  ;;  %v2112_v44 = vld [vmem:[#allocation9 + $0x130] sm:$0xff] }
 0x1d6   : > { %v1444_v42 = vpop.f32.mrf.mxu0 }
 0x1d7   : > { %v1483_v60 = vadd.f32 %v1444_v42, %v1332_v15  ;;  %v1634_v8 = vadd.f32 %v3720_v38, %v1484_v58  ;;  %v3729_v39 = vpop.f32.mrf.mxu1 }
 0x1d8   : > { %v3709_v49 = vpop.f32.mrf.mxu0 }
 0x1d9   : > { %v1486_v61 = vadd.f32 %v3709_v49, %v1335_v18  ;;  %v1633_v27 = vadd.f32 %v1594_v47, %v1483_v60 }
 0x1da   : > { %v1454_v51 = vpop.f32.mrf.mxu0 }
 0x1db   : > { %v1485_v19 = vadd.f32 %v1454_v51, %v1334_v62  ;;  %v1636_v33 = vadd.f32 %v3723_v3, %v1486_v61 }
 0x1dc   : > { %v3712_v5 = vpop.f32.mrf.mxu0 }
 0x1dd   : > { %v1488_v28 = vadd.f32 %v3712_v5, %v1337_v17  ;;  %v1635_v42 = vadd.f32 %v1604_v57, %v1485_v19  ;;  %v1624_v5 = vpop.f32.mrf.mxu1 }
 0x1de   : > { %v1464_v13 = vpop.f32.mrf.mxu0 }
 0x1df   : > { %v1487_v34 = vadd.f32 %v1464_v13, %v1336_v30  ;;  %v1638_v48 = vadd.f32 %v3726_v6, %v1488_v28  ;;  %v2120_v13 = vld [vmem:[#allocation9 + $0x170] sm:$0xff]  ;;  %v2118_v6 = vld [vmem:[#allocation9 + $0x160] sm:$0xff]  ;;  %v5194_v30 = vld [vmem:[#allocation15_spill] sm:$0xff] }
 0x1e0   : > { %v3715_v59 = vpop.f32.mrf.mxu0 }
 0x1e1   : > { %v1490_v43 = vadd.f32 %v3715_v59, %v1339_v37  ;;  %v1637_v53 = vadd.f32 %v1614_v23, %v1487_v34  ;;  %v2119_v59 = vld [vmem:[#allocation9 + $0x168] sm:$0xff] }
 0x1e2   : > { %v1474_v50 = vpop.f32.mrf.mxu0 }
 0x1e3   : > { %v1489_v3 = vadd.f32 %v1474_v50, %v1338_v46  ;;  %v1640_v56 = vadd.f32 %v3729_v39, %v1490_v43  ;;  %v2253_v39 = vld [vmem:[#allocation9 + $0x1c8] sm:$0xff]  ;;  %v2251_v43 = vld [vmem:[#allocation9 + $0x1b8] sm:$0xff]  ;;  %v2250_v46 = vld [vmem:[#allocation9 + $0x1b0] sm:$0xff] }
 0x1e4   : > { %v3734_v22 = vpop.f32.mrf.mxu0 }
 0x1e5   : > { %v1784_v26 = vadd.f32 %v3734_v22, %v1634_v8  ;;  %v1639_v16 = vadd.f32 %v1624_v5, %v1489_v3  ;;  %v2247_v3 = vld [vmem:[#allocation9 + $0x198] sm:$0xff]  ;;  %v2107_v5 = vld [vmem:[#allocation9 + $0x108] sm:$0xff] }
 0x1e6   : > { %v1744_v14 = vpop.f32.mrf.mxu0 }
 0x1e7   : > { %v1799_v31 = vmul.f32 %v4870_v10, %v1784_v26  ;;  %v1783_v32 = vadd.f32 %v1744_v14, %v1633_v27  ;;  %v2258_v27 = vld [vmem:[#allocation9 + $0x1f0] sm:$0xff]  ;;  %v2257_v14 = vld [vmem:[#allocation9 + $0x1e8] sm:$0xff] }
 0x1e8   : > { %v3737_v38 = vpop.f32.mrf.mxu0 }
 0x1e9   : > { %v1814_v35 = vadd.f32 %v4876_v21, %v1799_v31  ;;  %v1798_v40 = vmul.f32 %v4870_v10, %v1783_v32  ;;  %v1786_v41 = vadd.f32 %v3737_v38, %v1636_v33  ;;  %v2116_v32 = vld [vmem:[#allocation9 + $0x150] sm:$0xff]  ;;  %v2255_v33 = vld [vmem:[#allocation9 + $0x1d8] sm:$0xff]  ;;  %v2115_v38 = vld [vmem:[#allocation9 + $0x148] sm:$0xff] }
 0x1ea   : > { %v1754_v47 = vpop.f32.mrf.mxu0 }
 0x1eb   : > { %v4883_v49 = vmax.f32 %v1814_v35, 0.0  ;;  %v1813_v51 = vadd.f32 %v4876_v21, %v1798_v40  ;;  %v1801_v1 = vmul.f32 %v4870_v10, %v1786_v41  ;;  %v1785_v52 = vadd.f32 %v1754_v47, %v1635_v42  ;;  %v2114_v40 = vld [vmem:[#allocation9 + $0x140] sm:$0xff]  ;;  %v2113_v42 = vld [vmem:[#allocation9 + $0x138] sm:$0xff]  ;;  %v2111_v47 = vld [vmem:[#allocation9 + $0x128] sm:$0xff] }
 0x1ec   : > { %v3740_v9 = vpop.f32.mrf.mxu0  ;;  %v2252_v41 = vld [vmem:[#allocation9 + $0x1c0] sm:$0xff] }
 0x1ed   : > { %1831 = vst [vmem:[#allocation3 + $0x38] sm:$0xff] %v4883_v49  ;;  %v4888_v11 = vmax.f32 %v1813_v51, 0.0  ;;  %v1816_v54 = vadd.f32 %v4876_v21, %v1801_v1  ;;  %v1800_v7 = vmul.f32 %v4870_v10, %v1785_v52  ;;  %v1788_v55 = vadd.f32 %v3740_v9, %v1638_v48  ;;  %v2249_v48 = vld [vmem:[#allocation9 + $0x1a8] sm:$0xff]  ;;  %v2110_v51 = vld [vmem:[#allocation9 + $0x120] sm:$0xff]  ;;  %v2109_v52 = vld [vmem:[#allocation9 + $0x118] sm:$0xff] }
 0x1ee   : > { %v1764_v63 = vpop.f32.mrf.mxu0  ;;  %v2248_v1 = vld [vmem:[#allocation9 + $0x1a0] sm:$0xff]  ;;  %v2108_v9 = vld [vmem:[#allocation9 + $0x110] sm:$0xff] }
 0x1ef   : > { %1830 = vst [vmem:[#allocation3 + $0x20] sm:$0xff] %v4888_v11  ;;  %v4893_v2 = vmax.f32 %v1816_v54, 0.0  ;;  %v1815_v57 = vadd.f32 %v4876_v21, %v1800_v7  ;;  %v1803_v58 = vmul.f32 %v4870_v10, %v1788_v55  ;;  %v1787_v15 = vadd.f32 %v1764_v63, %v1637_v53  ;;  %3777 = vmatmul.mubr.f32.vlgmr.msra.gmra.mxu1 %v4888_v11  ;;  %v2246_v53 = vld [vmem:[#allocation9 + $0x190] sm:$0xff]  ;;  %v2245_v54 = vld [vmem:[#allocation9 + $0x188] sm:$0xff]  ;;  %v2106_v7 = vld [vmem:[#allocation9 + $0x100] sm:$0xff] }
 0x1f0   : > { %v3743_v4 = vpop.f32.mrf.mxu0  ;;  %3833 = vmatpush3.msra.mxu1 %v5193_v24  ;;  %3779 = vmatprep.mubr.f32.mxu1 %v4883_v49  ;;  %v2244_v55 = vld [vmem:[#allocation9 + $0x180] sm:$0xff]  ;;  %v2397_v63 = vld [vmem:[#allocation9 + $0x278] sm:$0xff] }
 0x1f1   : > { %1833 = vst [vmem:[#allocation3 + $0x68] sm:$0xff] %v4893_v2  ;;  %v4901_v60 = vmax.f32 %v1815_v57, 0.0  ;;  %v1818_v18 = vadd.f32 %v4876_v21, %v1803_v58  ;;  %v1802_v25 = vmul.f32 %v4870_v10, %v1787_v15  ;;  %v1790_v45 = vadd.f32 %v3743_v4, %v1640_v56  ;;  %3834 = vmatprep.subr.mxu1 %v2120_v13  ;;  %v2097_v56 = vld [vmem:[#allocation3 + $0x9] sm:$0xff]  ;;  %v2395_v4 = vld [vmem:[#allocation9 + $0x268] sm:$0xff] }
 0x1f2   : > { %v1774_v50 = vpop.f32.mrf.mxu0  ;;  %3835 = vmatpush3.msra.mxu1 %v2120_v13  ;;  %v2535_v57 = vld [vmem:[#allocation9 + $0x2f8] sm:$0xff]  ;;  %v2396_v15 = vld [vmem:[#allocation9 + $0x270] sm:$0xff] }
 0x1f3   : > { %1832 = vst [vmem:[#allocation3 + $0x50] sm:$0xff] %v4901_v60  ;;  %v4906_v61 = vmax.f32 %v1818_v18, 0.0  ;;  %v1817_v62 = vadd.f32 %v4876_v21, %v1802_v25  ;;  %v1805_v8 = vmul.f32 %v4870_v10, %v1790_v45  ;;  %v1789_v0 = vadd.f32 %v1774_v50, %v1639_v16  ;;  %3836 = vmatprep.subr.mxu1 %v2119_v59  ;;  %v2534_v16 = vld [vmem:[#allocation9 + $0x2f0] sm:$0xff]  ;;  %v2394_v25 = vld [vmem:[#allocation9 + $0x260] sm:$0xff]  ;;  %v2393_v50 = vld [vmem:[#allocation9 + $0x258] sm:$0xff] }
 0x1f4   : > { %3780 = vmatmul.mubr.f32.gmra.mxu1 %v4901_v60  ;;  %v4921_v29 = vld [vmem:[#allocation3 + $0x37] sm:$0xff] }
 0x1f5   : > { %3837 = vmatpush3.msra.mxu1 %v2119_v59  ;;  %3782 = vmatprep.mubr.f32.mxu1 %v4893_v2  ;;  %1835 = vst [vmem:[#allocation3 + $0x98] sm:$0xff] %v4906_v61  ;;  %v4913_v17 = vmax.f32 %v1817_v62, 0.0  ;;  %v1820_v22 = vadd.f32 %v4876_v21, %v1805_v8  ;;  %v1804_v19 = vmul.f32 %v4870_v10, %v1789_v0  ;;  %v4951_v58 = vld [vmem:[#allocation3 + $0x39] sm:$0xff]  ;;  %v2531_v62 = vld [vmem:[#allocation9 + $0x2d8] sm:$0xff]  ;;  %v2392_v0 = vld [vmem:[#allocation9 + $0x250] sm:$0xff] }
 0x1f6   : > { %3838 = vmatprep.subr.mxu1 %v2118_v6  ;;  %v1839_v26 = vld [vmem:[#allocation3 + $0x1f] sm:$0xff]  ;;  %v2532_v45 = vld [vmem:[#allocation9 + $0x2e0] sm:$0xff] }
 0x1f7   : > { %3839 = vmatpush3.msra.mxu1 %v2118_v6  ;;  %1834 = vst [vmem:[#allocation3 + $0x80] sm:$0xff] %v4913_v17  ;;  %v4918_v12 = vmax.f32 %v1820_v22, 0.0  ;;  %v1819_v28 = vadd.f32 %v4876_v21, %v1804_v19  ;;  %3821 = vmatmul.mubr.f32.vlgmr.msra.gmra.mxu0 %v1839_v26  ;;  %v2256_v21 = vld [vmem:[#allocation9 + $0x1e0] sm:$0xff]  ;;  %v4947_v13 = vld [vmem:[#allocation3 + $0x21] sm:$0xff] }
 0x1f8   : > { %3840 = vmatprep.subr.mxu1 %v2117_v20  ;;  %3877 = vmatpush3.msra.mxu0 %v5194_v30  ;;  %v4933_v31 = vld [vmem:[#allocation3 + $0x67] sm:$0xff]  ;;  %v2533_v59 = vld [vmem:[#allocation9 + $0x2e8] sm:$0xff]  ;;  %v2528_v30 = vld [vmem:[#allocation9 + $0x2c0] sm:$0xff] }
 0x1f9   : > { %3823 = vmatprep.mubr.f32.mxu0 %v4921_v29  ;;  %1837 = vst [vmem:[#allocation3 + $0xc8] sm:$0xff] %v4918_v12  ;;  %v4926_v10 = vmax.f32 %v1819_v28, 0.0  ;;  %3878 = vmatprep.subr.mxu0 %v2258_v27  ;;  %v4959_v18 = vld [vmem:[#allocation3 + $0x69] sm:$0xff]  ;;  %v2391_v22 = vld [vmem:[#allocation9 + $0x248] sm:$0xff]  ;;  %v2390_v28 = vld [vmem:[#allocation9 + $0x240] sm:$0xff] }
 0x1fa   : > { %3783 = vmatmul.mubr.f32.gmra.mxu1 %v4913_v17  ;;  %3879 = vmatpush3.msra.mxu0 %v2258_v27  ;;  %v4929_v23 = vld [vmem:[#allocation3 + $0x4f] sm:$0xff] }
 0x1fb   : > { %3841 = vmatpush3.msra.mxu1 %v2117_v20  ;;  %1836 = vst [vmem:[#allocation3 + $0xb0] sm:$0xff] %v4926_v10  ;;  %3880 = vmatprep.subr.mxu0 %v2257_v14  ;;  %v4955_v24 = vld [vmem:[#allocation3 + $0x51] sm:$0xff]  ;;  %v2530_v20 = vld [vmem:[#allocation9 + $0x2d0] sm:$0xff] }
 0x1fc   : > { %3824 = vmatmul.mubr.f32.gmra.mxu0 %v4929_v23  ;;  %3785 = vmatprep.mubr.f32.mxu1 %v4906_v61  ;;  %v4940_v37 = vld [vmem:[#allocation3 + $0x97] sm:$0xff] }
 0x1fd   : > { %3881 = vmatpush3.msra.mxu0 %v2257_v14  ;;  %3826 = vmatprep.mubr.f32.mxu0 %v4933_v31  ;;  %v4967_v8 = vld [vmem:[#allocation3 + $0x99] sm:$0xff]  ;;  %v2389_v14 = vld [vmem:[#allocation9 + $0x238] sm:$0xff] }
 0x1fe   : > { %3882 = vmatprep.subr.mxu0 %v2256_v21  ;;  %v4937_v34 = vld [vmem:[#allocation3 + $0x7f] sm:$0xff]  ;;  %3842 = vmatprep.subr.mxu1 %v2116_v32 }
 0x1ff   : > { %3883 = vmatpush3.msra.mxu0 %v2256_v21  ;;  %3843 = vmatpush3.msra.mxu1 %v2116_v32  ;;  %v4963_v6 = vld [vmem:[#allocation3 + $0x81] sm:$0xff]  ;;  %v2527_v21 = vld [vmem:[#allocation9 + $0x2b8] sm:$0xff] }
 0x200   : > { %3884 = vmatprep.subr.mxu0 %v2255_v33  ;;  %3827 = vmatmul.mubr.f32.gmra.mxu0 %v4937_v34  ;;  %v4974_v27 = vld [vmem:[#allocation3 + $0xc7] sm:$0xff] }
 0x201   : > { %3885 = vmatpush3.msra.mxu0 %v2255_v33  ;;  %3829 = vmatprep.mubr.f32.mxu0 %v4940_v37  ;;  %v2388_v32 = vld [vmem:[#allocation9 + $0x230] sm:$0xff] }
 0x202   : > { %3886 = vmatprep.subr.mxu0 %v2254_v36  ;;  %3844 = vmatprep.subr.mxu1 %v2115_v38  ;;  %v4943_v35 = vld [vmem:[#allocation3 + $0xaf] sm:$0xff]  ;;  %v2526_v33 = vld [vmem:[#allocation9 + $0x2b0] sm:$0xff] }
 0x203   : > { %3887 = vmatpush3.msra.mxu0 %v2254_v36  ;;  %3786 = vmatmul.mubr.f32.gmra.mxu1 %v4926_v10  ;;  %v4971_v19 = vld [vmem:[#allocation3 + $0xb1] sm:$0xff]  ;;  %v2387_v36 = vld [vmem:[#allocation9 + $0x228] sm:$0xff] }
 0x204   : > { %3888 = vmatprep.subr.mxu0 %v2253_v39  ;;  %3830 = vmatmul.mubr.f32.gmra.mxu0 %v4943_v35 }
 0x205   : > { %3845 = vmatpush3.msra.mxu1 %v2115_v38  ;;  %3889 = vmatpush3.msra.mxu0 %v2253_v39  ;;  %v2525_v38 = vld [vmem:[#allocation9 + $0x2a8] sm:$0xff]  ;;  %v2524_v39 = vld [vmem:[#allocation9 + $0x2a0] sm:$0xff] }
 0x206   : > { %3846 = vmatprep.subr.mxu1 %v2114_v40  ;;  %3890 = vmatprep.subr.mxu0 %v2252_v41 }
 0x207   : > { %3908 = vmatprep.mubr.f32.mxu0 %v1839_v26  ;;  %3847 = vmatpush3.msra.mxu1 %v2114_v40  ;;  %v2529_v26 = vld [vmem:[#allocation9 + $0x2c8] sm:$0xff]  ;;  %v2385_v40 = vld [vmem:[#allocation9 + $0x218] sm:$0xff] }
 0x208   : > { %3891 = vmatpush3.msra.mxu0 %v2252_v41  ;;  %3848 = vmatprep.subr.mxu1 %v2113_v42  ;;  %v2523_v41 = vld [vmem:[#allocation9 + $0x298] sm:$0xff] }
 0x209   : > { %3892 = vmatprep.subr.mxu0 %v2251_v43  ;;  %3849 = vmatpush3.msra.mxu1 %v2113_v42  ;;  %v2384_v42 = vld [vmem:[#allocation9 + $0x210] sm:$0xff] }
 0x20a   : > { %3893 = vmatpush3.msra.mxu0 %v2251_v43  ;;  %3850 = vmatprep.subr.mxu1 %v2112_v44  ;;  %v2522_v43 = vld [vmem:[#allocation9 + $0x290] sm:$0xff] }
 0x20b   : > { %3894 = vmatprep.subr.mxu0 %v2250_v46  ;;  %3851 = vmatpush3.msra.mxu1 %v2112_v44  ;;  %v2383_v44 = vld [vmem:[#allocation9 + $0x208] sm:$0xff] }
 0x20c   : > { %3895 = vmatpush3.msra.mxu0 %v2250_v46  ;;  %3852 = vmatprep.subr.mxu1 %v2111_v47  ;;  %v2521_v46 = vld [vmem:[#allocation9 + $0x288] sm:$0xff] }
 0x20d   : > { %3896 = vmatprep.subr.mxu0 %v2249_v48  ;;  %3853 = vmatpush3.msra.mxu1 %v2111_v47  ;;  %v2382_v47 = vld [vmem:[#allocation9 + $0x200] sm:$0xff] }
 0x20e   : > { %3897 = vmatpush3.msra.mxu0 %v2249_v48  ;;  %3854 = vmatprep.subr.mxu1 %v2110_v51  ;;  %v2520_v48 = vld [vmem:[#allocation9 + $0x280] sm:$0xff] }
 0x20f   : > { %3898 = vmatprep.subr.mxu0 %v2248_v1  ;;  %3855 = vmatpush3.msra.mxu1 %v2110_v51  ;;  %v2674_v51 = vld [vmem:[#allocation9 + $0x378] sm:$0xff] }
 0x210   : > { %3899 = vmatpush3.msra.mxu0 %v2248_v1  ;;  %3856 = vmatprep.subr.mxu1 %v2109_v52  ;;  %v2812_v1 = vld [vmem:[#allocation9 + $0x3f8] sm:$0xff] }
 0x211   : > { %3900 = vmatprep.subr.mxu0 %v2247_v3  ;;  %3857 = vmatpush3.msra.mxu1 %v2109_v52  ;;  %v2673_v52 = vld [vmem:[#allocation9 + $0x370] sm:$0xff] }
 0x212   : > { %3901 = vmatpush3.msra.mxu0 %v2247_v3  ;;  %3858 = vmatprep.subr.mxu1 %v2108_v9  ;;  %v2811_v3 = vld [vmem:[#allocation9 + $0x3f0] sm:$0xff] }
 0x213   : > { %3902 = vmatprep.subr.mxu0 %v2246_v53  ;;  %3859 = vmatpush3.msra.mxu1 %v2108_v9  ;;  %v2672_v9 = vld [vmem:[#allocation9 + $0x368] sm:$0xff] }
 0x214   : > { %3903 = vmatpush3.msra.mxu0 %v2246_v53  ;;  %3860 = vmatprep.subr.mxu1 %v2107_v5  ;;  %v2810_v53 = vld [vmem:[#allocation9 + $0x3e8] sm:$0xff] }
 0x215   : > { %3904 = vmatprep.subr.mxu0 %v2245_v54  ;;  %3861 = vmatpush3.msra.mxu1 %v2107_v5  ;;  %v2671_v5 = vld [vmem:[#allocation9 + $0x360] sm:$0xff] }
 0x216   : > { %3905 = vmatpush3.msra.mxu0 %v2245_v54  ;;  %3862 = vmatprep.subr.mxu1 %v2106_v7  ;;  %v2809_v54 = vld [vmem:[#allocation9 + $0x3e0] sm:$0xff] }
 0x217   : > { %3906 = vmatprep.subr.mxu0 %v2244_v55  ;;  %3863 = vmatpush3.msra.mxu1 %v2106_v7  ;;  %v2670_v7 = vld [vmem:[#allocation9 + $0x358] sm:$0xff] }
 0x218   : > { %3864 = vmatprep.mubr.f32.mxu1 %v2097_v56  ;;  %3907 = vmatpush3.msra.mxu0 %v2244_v55  ;;  %v2808_v55 = vld [vmem:[#allocation9 + $0x3d8] sm:$0xff]  ;;  %v2669_v56 = vld [vmem:[#allocation9 + $0x350] sm:$0xff] }
 0x219   : > { %3865 = vmatmul.mubr.f32.vlgmr.msra.gmra.mxu1 %v4947_v13  ;;  %3909 = vmatmul.mubr.f32.vlgmr.msra.gmra.mxu0 %v4921_v29 }
 0x21a   : > { %3920 = vmatprep.subr.mxu1 %v2397_v63  ;;  %3964 = vmatprep.subr.mxu0 %v2535_v57 }
 0x21b   : > { %3867 = vmatprep.mubr.f32.mxu1 %v4951_v58  ;;  %3911 = vmatprep.mubr.f32.mxu0 %v4929_v23 }
 0x21c   : > { %3921 = vmatpush3.msra.mxu1 %v2397_v63  ;;  %3965 = vmatpush3.msra.mxu0 %v2535_v57  ;;  %v2807_v63 = vld [vmem:[#allocation9 + $0x3d0] sm:$0xff]  ;;  %v2806_v57 = vld [vmem:[#allocation9 + $0x3c8] sm:$0xff] }
 0x21d   : > { %3922 = vmatprep.subr.mxu1 %v2396_v15  ;;  %3966 = vmatprep.subr.mxu0 %v2534_v16 }
 0x21e   : > { %3923 = vmatpush3.msra.mxu1 %v2396_v15  ;;  %3967 = vmatpush3.msra.mxu0 %v2534_v16  ;;  %v4992_v15 = vld [vmem:[#allocation3 + $0xc9] sm:$0xff]  ;;  %v2667_v16 = vld [vmem:[#allocation9 + $0x340] sm:$0xff] }
 0x21f   : > { %3868 = vmatmul.mubr.f32.gmra.mxu1 %v4955_v24  ;;  %3912 = vmatmul.mubr.f32.gmra.mxu0 %v4933_v31 }
 0x220   : > { %3924 = vmatprep.subr.mxu1 %v2395_v4  ;;  %3968 = vmatprep.subr.mxu0 %v2533_v59 }
 0x221   : > { %3870 = vmatprep.mubr.f32.mxu1 %v4959_v18  ;;  %3914 = vmatprep.mubr.f32.mxu0 %v4937_v34 }
 0x222   : > { %3925 = vmatpush3.msra.mxu1 %v2395_v4  ;;  %3969 = vmatpush3.msra.mxu0 %v2533_v59  ;;  %v2805_v4 = vld [vmem:[#allocation9 + $0x3c0] sm:$0xff]  ;;  %v2666_v59 = vld [vmem:[#allocation9 + $0x338] sm:$0xff] }
 0x223   : > { %3926 = vmatprep.subr.mxu1 %v2394_v25  ;;  %3970 = vmatprep.subr.mxu0 %v2532_v45 }
 0x224   : > { %3927 = vmatpush3.msra.mxu1 %v2394_v25  ;;  %3971 = vmatpush3.msra.mxu0 %v2532_v45  ;;  %v2804_v25 = vld [vmem:[#allocation9 + $0x3b8] sm:$0xff]  ;;  %v2665_v45 = vld [vmem:[#allocation9 + $0x330] sm:$0xff] }
 0x225   : > { %3871 = vmatmul.mubr.f32.gmra.mxu1 %v4963_v6  ;;  %3915 = vmatmul.mubr.f32.gmra.mxu0 %v4940_v37 }
 0x226   : > { %3928 = vmatprep.subr.mxu1 %v2393_v50  ;;  %3972 = vmatprep.subr.mxu0 %v2531_v62 }
 0x227   : > { %3873 = vmatprep.mubr.f32.mxu1 %v4967_v8  ;;  %3917 = vmatprep.mubr.f32.mxu0 %v4943_v35 }
 0x228   : > { %3929 = vmatpush3.msra.mxu1 %v2393_v50  ;;  %3973 = vmatpush3.msra.mxu0 %v2531_v62  ;;  %v2803_v50 = vld [vmem:[#allocation9 + $0x3b0] sm:$0xff]  ;;  %v2664_v62 = vld [vmem:[#allocation9 + $0x328] sm:$0xff] }
 0x229   : > { %3930 = vmatprep.subr.mxu1 %v2392_v0  ;;  %3974 = vmatprep.subr.mxu0 %v2530_v20 }
 0x22a   : > { %3931 = vmatpush3.msra.mxu1 %v2392_v0  ;;  %3975 = vmatpush3.msra.mxu0 %v2530_v20  ;;  %v2802_v0 = vld [vmem:[#allocation9 + $0x3a8] sm:$0xff]  ;;  %v2662_v20 = vld [vmem:[#allocation9 + $0x318] sm:$0xff] }
 0x22b   : > { %3874 = vmatmul.mubr.f32.gmra.mxu1 %v4971_v19  ;;  %3918 = vmatmul.mubr.f32.gmra.mxu0 %v4974_v27 }
 0x22c   : > { %3932 = vmatprep.subr.mxu1 %v2391_v22  ;;  %3976 = vmatprep.subr.mxu0 %v2529_v26 }
 0x22d   : > { %3933 = vmatpush3.msra.mxu1 %v2391_v22  ;;  %3952 = vmatprep.mubr.f32.mxu1 %v4888_v11  ;;  %v2386_v11 = vld [vmem:[#allocation9 + $0x220] sm:$0xff]  ;;  %v2800_v22 = vld [vmem:[#allocation9 + $0x398] sm:$0xff] }
 0x22e   : > { %3977 = vmatpush3.msra.mxu0 %v2529_v26  ;;  %3996 = vmatprep.mubr.f32.mxu0 %v4947_v13  ;;  %v2668_v13 = vld [vmem:[#allocation9 + $0x348] sm:$0xff]  ;;  %v2661_v26 = vld [vmem:[#allocation9 + $0x310] sm:$0xff] }
 0x22f   : > { %3934 = vmatprep.subr.mxu1 %v2390_v28  ;;  %3978 = vmatprep.subr.mxu0 %v2528_v30 }
 0x230   : > { %3935 = vmatpush3.msra.mxu1 %v2390_v28  ;;  %3979 = vmatpush3.msra.mxu0 %v2528_v30  ;;  %v2799_v28 = vld [vmem:[#allocation9 + $0x390] sm:$0xff]  ;;  %v2660_v30 = vld [vmem:[#allocation9 + $0x308] sm:$0xff] }
 0x231   : > { %3936 = vmatprep.subr.mxu1 %v2389_v14  ;;  %3980 = vmatprep.subr.mxu0 %v2527_v21 }
 0x232   : > { %3937 = vmatpush3.msra.mxu1 %v2389_v14  ;;  %3981 = vmatpush3.msra.mxu0 %v2527_v21  ;;  %v2798_v14 = vld [vmem:[#allocation9 + $0x388] sm:$0xff]  ;;  %v2659_v21 = vld [vmem:[#allocation9 + $0x300] sm:$0xff] }
 0x233   : > { %3938 = vmatprep.subr.mxu1 %v2388_v32  ;;  %3982 = vmatprep.subr.mxu0 %v2526_v33 }
 0x234   : > { %3939 = vmatpush3.msra.mxu1 %v2388_v32  ;;  %3983 = vmatpush3.msra.mxu0 %v2526_v33  ;;  %v2797_v32 = vld [vmem:[#allocation9 + $0x380] sm:$0xff]  ;;  %v2950_v33 = vld [vmem:[#allocation9 + $0x478] sm:$0xff] }
 0x235   : > { %3940 = vmatprep.subr.mxu1 %v2387_v36  ;;  %3984 = vmatprep.subr.mxu0 %v2525_v38 }
 0x236   : > { %3941 = vmatpush3.msra.mxu1 %v2387_v36  ;;  %3985 = vmatpush3.msra.mxu0 %v2525_v38  ;;  %v2949_v36 = vld [vmem:[#allocation9 + $0x470] sm:$0xff]  ;;  %v2948_v38 = vld [vmem:[#allocation9 + $0x468] sm:$0xff] }
 0x237   : > { %3942 = vmatprep.subr.mxu1 %v2386_v11  ;;  %3986 = vmatprep.subr.mxu0 %v2524_v39 }
 0x238   : > { %3943 = vmatpush3.msra.mxu1 %v2386_v11  ;;  %3987 = vmatpush3.msra.mxu0 %v2524_v39  ;;  %v2947_v11 = vld [vmem:[#allocation9 + $0x460] sm:$0xff] }
 0x239   : > { %3944 = vmatprep.subr.mxu1 %v2385_v40  ;;  %3988 = vmatprep.subr.mxu0 %v2523_v41  ;;  %v2935_v39 = vld [vmem:[#allocation9 + $0x400] sm:$0xff] }
 0x23a   : > { %3945 = vmatpush3.msra.mxu1 %v2385_v40  ;;  %3989 = vmatpush3.msra.mxu0 %v2523_v41  ;;  %v2933_v40 = vld [vmem:[#allocation3 + $0xe1] sm:$0xff] }
 0x23b   : > { %3946 = vmatprep.subr.mxu1 %v2384_v42  ;;  %3990 = vmatprep.subr.mxu0 %v2522_v43 }
 0x23c   : > { %3947 = vmatpush3.msra.mxu1 %v2384_v42  ;;  %3991 = vmatpush3.msra.mxu0 %v2522_v43 }
 0x23d   : > { %3948 = vmatprep.subr.mxu1 %v2383_v44  ;;  %3992 = vmatprep.subr.mxu0 %v2521_v46 }
 0x23e   : > { %3949 = vmatpush3.msra.mxu1 %v2383_v44  ;;  %3993 = vmatpush3.msra.mxu0 %v2521_v46 }
 0x23f   : > { %3950 = vmatprep.subr.mxu1 %v2382_v47  ;;  %3994 = vmatprep.subr.mxu0 %v2520_v48 }
 0x240   : > { %3951 = vmatpush3.msra.mxu1 %v2382_v47  ;;  %3995 = vmatpush3.msra.mxu0 %v2520_v48 }
 0x241   : > { %3953 = vmatmul.mubr.f32.vlgmr.msra.gmra.mxu1 %v4883_v49  ;;  %3997 = vmatmul.mubr.f32.vlgmr.msra.gmra.mxu0 %v4951_v58 }
 0x242   : > { %4008 = vmatprep.subr.mxu1 %v2674_v51  ;;  %4052 = vmatprep.subr.mxu0 %v2812_v1 }
 0x243   : > { %3955 = vmatprep.mubr.f32.mxu1 %v4901_v60  ;;  %3999 = vmatprep.mubr.f32.mxu0 %v4955_v24 }
 0x244   : > { %4009 = vmatpush3.msra.mxu1 %v2674_v51  ;;  %4053 = vmatpush3.msra.mxu0 %v2812_v1 }
 0x245   : > { %4010 = vmatprep.subr.mxu1 %v2673_v52  ;;  %4054 = vmatprep.subr.mxu0 %v2811_v3 }
 0x246   : > { %4011 = vmatpush3.msra.mxu1 %v2673_v52  ;;  %4055 = vmatpush3.msra.mxu0 %v2811_v3 }
 0x247   : > { %3956 = vmatmul.mubr.f32.gmra.mxu1 %v4893_v2  ;;  %4000 = vmatmul.mubr.f32.gmra.mxu0 %v4959_v18 }
 0x248   : > { %4012 = vmatprep.subr.mxu1 %v2672_v9  ;;  %4056 = vmatprep.subr.mxu0 %v2810_v53 }
 0x249   : > { %3958 = vmatprep.mubr.f32.mxu1 %v4913_v17  ;;  %4002 = vmatprep.mubr.f32.mxu0 %v4963_v6 }
 0x24a   : > { %4013 = vmatpush3.msra.mxu1 %v2672_v9  ;;  %4057 = vmatpush3.msra.mxu0 %v2810_v53 }
 0x24b   : > { %4014 = vmatprep.subr.mxu1 %v2671_v5  ;;  %4058 = vmatprep.subr.mxu0 %v2809_v54 }
 0x24c   : > { %4015 = vmatpush3.msra.mxu1 %v2671_v5  ;;  %4059 = vmatpush3.msra.mxu0 %v2809_v54 }
 0x24d   : > { %3959 = vmatmul.mubr.f32.gmra.mxu1 %v4906_v61  ;;  %4003 = vmatmul.mubr.f32.gmra.mxu0 %v4967_v8 }
 0x24e   : > { %4016 = vmatprep.subr.mxu1 %v2670_v7  ;;  %4060 = vmatprep.subr.mxu0 %v2808_v55 }
 0x24f   : > { %3961 = vmatprep.mubr.f32.mxu1 %v4926_v10  ;;  %4005 = vmatprep.mubr.f32.mxu0 %v4971_v19 }
 0x250   : > { %4017 = vmatpush3.msra.mxu1 %v2670_v7  ;;  %4061 = vmatpush3.msra.mxu0 %v2808_v55 }
 0x251   : > { %4018 = vmatprep.subr.mxu1 %v2669_v56  ;;  %4062 = vmatprep.subr.mxu0 %v2807_v63 }
 0x252   : > { %4019 = vmatpush3.msra.mxu1 %v2669_v56  ;;  %4063 = vmatpush3.msra.mxu0 %v2807_v63 }
 0x253   : > { %3962 = vmatmul.mubr.f32.gmra.mxu1 %v4918_v12  ;;  %4006 = vmatmul.mubr.f32.gmra.mxu0 %v4992_v15 }
 0x254   : > { %4020 = vmatprep.subr.mxu1 %v2668_v13  ;;  %4064 = vmatprep.subr.mxu0 %v2806_v57 }
 0x255   : > { %4021 = vmatpush3.msra.mxu1 %v2668_v13  ;;  %4040 = vmatprep.mubr.f32.mxu1 %v4921_v29  ;;  %v2663_v29 = vld [vmem:[#allocation9 + $0x320] sm:$0xff] }
 0x256   : > { %4065 = vmatpush3.msra.mxu0 %v2806_v57  ;;  %4084 = vmatprep.mubr.f32.mxu0 %v4883_v49  ;;  %v2801_v49 = vld [vmem:[#allocation9 + $0x3a0] sm:$0xff] }
 0x257   : > { %4022 = vmatprep.subr.mxu1 %v2667_v16  ;;  %4066 = vmatprep.subr.mxu0 %v2805_v4 }
 0x258   : > { %4023 = vmatpush3.msra.mxu1 %v2667_v16  ;;  %4067 = vmatpush3.msra.mxu0 %v2805_v4 }
 0x259   : > { %4024 = vmatprep.subr.mxu1 %v2666_v59  ;;  %4068 = vmatprep.subr.mxu0 %v2804_v25 }
 0x25a   : > { %4025 = vmatpush3.msra.mxu1 %v2666_v59  ;;  %4069 = vmatpush3.msra.mxu0 %v2804_v25 }
 0x25b   : > { %4026 = vmatprep.subr.mxu1 %v2665_v45  ;;  %4070 = vmatprep.subr.mxu0 %v2803_v50 }
 0x25c   : > { %4027 = vmatpush3.msra.mxu1 %v2665_v45  ;;  %4071 = vmatpush3.msra.mxu0 %v2803_v50 }
 0x25d   : > { %4028 = vmatprep.subr.mxu1 %v2664_v62  ;;  %4072 = vmatprep.subr.mxu0 %v2802_v0 }
 0x25e   : > { %4029 = vmatpush3.msra.mxu1 %v2664_v62  ;;  %4073 = vmatpush3.msra.mxu0 %v2802_v0 }
 0x25f   : > { %4030 = vmatprep.subr.mxu1 %v2663_v29  ;;  %4074 = vmatprep.subr.mxu0 %v2801_v49 }
 0x260   : > { %4031 = vmatpush3.msra.mxu1 %v2663_v29  ;;  %4075 = vmatpush3.msra.mxu0 %v2801_v49 }
 0x261   : > { %4032 = vmatprep.subr.mxu1 %v2662_v20  ;;  %4076 = vmatprep.subr.mxu0 %v2800_v22 }
 0x262   : > { %4033 = vmatpush3.msra.mxu1 %v2662_v20  ;;  %4077 = vmatpush3.msra.mxu0 %v2800_v22 }
 0x263   : > { %4034 = vmatprep.subr.mxu1 %v2661_v26  ;;  %4078 = vmatprep.subr.mxu0 %v2799_v28 }
 0x264   : > { %4035 = vmatpush3.msra.mxu1 %v2661_v26  ;;  %4079 = vmatpush3.msra.mxu0 %v2799_v28 }
 0x265   : > { %4036 = vmatprep.subr.mxu1 %v2660_v30  ;;  %4080 = vmatprep.subr.mxu0 %v2798_v14 }
 0x266   : > { %4037 = vmatpush3.msra.mxu1 %v2660_v30  ;;  %4081 = vmatpush3.msra.mxu0 %v2798_v14 }
 0x267   : > { %4038 = vmatprep.subr.mxu1 %v2659_v21  ;;  %4082 = vmatprep.subr.mxu0 %v2797_v32 }
 0x268   : > { %4039 = vmatpush3.msra.mxu1 %v2659_v21  ;;  %4083 = vmatpush3.msra.mxu0 %v2797_v32 }
 0x269   : > { %4041 = vmatmul.mubr.f32.vlgmr.msra.gmra.mxu1 %v4929_v23  ;;  %4085 = vmatmul.mubr.f32.vlgmr.msra.gmra.mxu0 %v4901_v60  ;;  %v2946_v60 = vld [vmem:[#allocation9 + $0x458] sm:$0xff]  ;;  %v2657_v23 = vld [vmem:[#allocation3 + $0xdf] sm:$0xff] }
 0x26a   : > { %4096 = vmatprep.subr.mxu1 %v2950_v33  ;;  %4043 = vmatprep.mubr.f32.mxu1 %v4933_v31  ;;  %v4217_v31 = vld [vmem:[#allocation3 + $0x8] sm:$0xff] }
 0x26b   : > { %4087 = vmatprep.mubr.f32.mxu0 %v4893_v2  ;;  %4097 = vmatpush3.msra.mxu1 %v2950_v33  ;;  %v2945_v2 = vld [vmem:[#allocation9 + $0x450] sm:$0xff] }
 0x26c   : > { %4098 = vmatprep.subr.mxu1 %v2949_v36 }
 0x26d   : > { %4044 = vmatmul.mubr.f32.gmra.mxu1 %v4937_v34  ;;  %4088 = vmatmul.mubr.f32.gmra.mxu0 %v4913_v17  ;;  %v2944_v17 = vld [vmem:[#allocation9 + $0x448] sm:$0xff]  ;;  %v2941_v34 = vld [vmem:[#allocation9 + $0x430] sm:$0xff] }
 0x26e   : > { %4099 = vmatpush3.msra.mxu1 %v2949_v36  ;;  %4046 = vmatprep.mubr.f32.mxu1 %v4940_v37  ;;  %v2940_v37 = vld [vmem:[#allocation9 + $0x428] sm:$0xff] }
 0x26f   : > { %4100 = vmatprep.subr.mxu1 %v2948_v38  ;;  %4090 = vmatprep.mubr.f32.mxu0 %v4906_v61  ;;  %v2943_v61 = vld [vmem:[#allocation9 + $0x440] sm:$0xff] }
 0x270   : > { %4101 = vmatpush3.msra.mxu1 %v2948_v38 }
 0x271   : > { %4102 = vmatprep.subr.mxu1 %v2947_v11  ;;  %4047 = vmatmul.mubr.f32.gmra.mxu1 %v4943_v35  ;;  %v2938_v35 = vld [vmem:[#allocation9 + $0x418] sm:$0xff] }
 0x272   : > { %4103 = vmatpush3.msra.mxu1 %v2947_v11  ;;  %4091 = vmatmul.mubr.f32.gmra.mxu0 %v4926_v10  ;;  %v2942_v10 = vld [vmem:[#allocation9 + $0x438] sm:$0xff] }
 0x273   : > { %4104 = vmatprep.subr.mxu1 %v2946_v60  ;;  %4049 = vmatprep.mubr.f32.mxu1 %v4974_v27  ;;  %v2936_v27 = vld [vmem:[#allocation9 + $0x408] sm:$0xff] }
 0x274   : > { %4093 = vmatprep.mubr.f32.mxu0 %v4918_v12  ;;  %4105 = vmatpush3.msra.mxu1 %v2946_v60  ;;  %v2939_v12 = vld [vmem:[#allocation9 + $0x420] sm:$0xff] }
 0x275   : > { %4106 = vmatprep.subr.mxu1 %v2945_v2  ;;  %4050 = vmatmul.mubr.f32.gmra.mxu1 %v2657_v23 }
 0x276   : > { %4107 = vmatpush3.msra.mxu1 %v2945_v2  ;;  %4128 = vmatprep.mubr.f32.mxu1 %v4951_v58  ;;  %v2937_v58 = vld [vmem:[#allocation9 + $0x410] sm:$0xff] }
 0x277   : > { %4108 = vmatprep.subr.mxu1 %v2944_v17  ;;  %4094 = vmatmul.mubr.f32.gmra.mxu0 %v4217_v31 }
 0x278   : > { %4109 = vmatpush3.msra.mxu1 %v2944_v17 }
 0x279   : > { %4110 = vmatprep.subr.mxu1 %v2943_v61 }
 0x27a   : > { %4111 = vmatpush3.msra.mxu1 %v2943_v61 }
 0x27b   : > { %4112 = vmatprep.subr.mxu1 %v2942_v10 }
 0x27c   : > { %4113 = vmatpush3.msra.mxu1 %v2942_v10 }
 0x27d   : > { %4114 = vmatprep.subr.mxu1 %v2941_v34 }
 0x27e   : > { %4115 = vmatpush3.msra.mxu1 %v2941_v34 }
 0x27f   : > { %4116 = vmatprep.subr.mxu1 %v2940_v37 }
 0x280   : > { %4117 = vmatpush3.msra.mxu1 %v2940_v37 }
 0x281   : > { %4118 = vmatprep.subr.mxu1 %v2939_v12 }
 0x282   : > { %4119 = vmatpush3.msra.mxu1 %v2939_v12 }
 0x283   : > { %4120 = vmatprep.subr.mxu1 %v2938_v35 }
 0x284   : > { %4121 = vmatpush3.msra.mxu1 %v2938_v35 }
 0x285   : > { %4122 = vmatprep.subr.mxu1 %v2937_v58 }
 0x286   : > { %4123 = vmatpush3.msra.mxu1 %v2937_v58 }
 0x287   : > { %4124 = vmatprep.subr.mxu1 %v2936_v27 }
 0x288   : > { %4125 = vmatpush3.msra.mxu1 %v2936_v27 }
 0x289   : > { %4126 = vmatprep.subr.mxu1 %v2935_v39 }
 0x28a   : > { %4127 = vmatpush3.msra.mxu1 %v2935_v39 }
 0x28b   : > { %4129 = vmatmul.mubr.f32.vlgmr.msra.gmra.mxu1 %v4955_v24 }
 0x28c   : > { %4131 = vmatprep.mubr.f32.mxu1 %v4959_v18 }
 0x28f   : > { %4132 = vmatmul.mubr.f32.gmra.mxu1 %v4963_v6 }
 0x290   : > { %4134 = vmatprep.mubr.f32.mxu1 %v4967_v8 }
 0x293   : > { %4135 = vmatmul.mubr.f32.gmra.mxu1 %v4971_v19 }
 0x294   : > { %4137 = vmatprep.mubr.f32.mxu1 %v4992_v15 }
 0x297   : > { %4138 = vmatmul.mubr.f32.gmra.mxu1 %v2933_v40 }
 0x2af   : > { %v3778_v41 = vpop.f32.mrf.mxu1 }
 0x2b1   : > { %v1953_v42 = vpop.f32.mrf.mxu1 }
 0x2b4   : > { %v3781_v43 = vpop.f32.mrf.mxu1 }
 0x2b6   : > { %v1963_v46 = vpop.f32.mrf.mxu1 }
 0x2b7   : > { %v3822_v44 = vpop.f32.mrf.mxu0 }
 0x2b8   : > { %v2064_v10 = vadd.f32 %v3822_v44, %v3778_v41 }
 0x2b9   : > { %v2058_v47 = vpop.f32.mrf.mxu0 }
 0x2ba   : > { %v3784_v48 = vpop.f32.mrf.mxu1  ;;  %v2059_v34 = vadd.f32 %v2058_v47, %v1953_v42 }
 0x2bc   : > { %v3825_v24 = vpop.f32.mrf.mxu0  ;;  %v5016_v51 = vpop.f32.mrf.mxu1 }
 0x2bd   : > { %v2074_v58 = vadd.f32 %v3825_v24, %v3781_v43 }
 0x2be   : > { %v2068_v18 = vpop.f32.mrf.mxu0 }
 0x2bf   : > { %v2069_v40 = vadd.f32 %v2068_v18, %v1963_v46 }
 0x2c0   : > { %v3828_v8 = vpop.f32.mrf.mxu0 }
 0x2c2   : > { %v2078_v52 = vpop.f32.mrf.mxu0 }
 0x2c3   : > { %v5018_v6 = vpop.f32.mrf.mxu1  ;;  %v2079_v42 = vadd.f32 %v2078_v52, %v5016_v51 }
 0x2c4   : > { %v5022_v9 = vpop.f32.mrf.mxu0 }
 0x2c5   : > { %v5020_v1 = vpop.f32.mrf.mxu1  ;;  %v2094_v46 = vadd.f32 %v5022_v9, %v5018_v6  ;;  %v5059_v6 = vld [vmem:[%s5159_s5] ss:$0 sm:$0xff] }
 0x2c6   : > { %v5024_v5 = vpop.f32.mrf.mxu0 }
 0x2d9   : > { %v3866_v19 = vpop.f32.mrf.mxu1  ;;  %v3910_v54 = vpop.f32.mrf.mxu0 }
 0x2da   : > { %v2228_v37 = vadd.f32 %v3866_v19, %v2064_v10 }
 0x2db   : > { %v2188_v3 = vpop.f32.mrf.mxu1  ;;  %v2326_v55 = vpop.f32.mrf.mxu0 }
 0x2dc   : > { %v2366_v27 = vadd.f32 %v3910_v54, %v2228_v37  ;;  %v2227_v39 = vadd.f32 %v2188_v3, %v2059_v34 }
 0x2df   : > { %v3869_v53 = vpop.f32.mrf.mxu1  ;;  %v3913_v63 = vpop.f32.mrf.mxu0 }
 0x2e1   : > { %v2198_v7 = vpop.f32.mrf.mxu1  ;;  %v2336_v57 = vpop.f32.mrf.mxu0 }
 0x2e5   : > { %v3872_v56 = vpop.f32.mrf.mxu1  ;;  %v3916_v16 = vpop.f32.mrf.mxu0 }
 0x2e7   : > { %v2208_v13 = vpop.f32.mrf.mxu1  ;;  %v2346_v25 = vpop.f32.mrf.mxu0 }
 0x2eb   : > { %v5026_v15 = vpop.f32.mrf.mxu1  ;;  %v5030_v50 = vpop.f32.mrf.mxu0 }
 0x2ec   : > { %5196 = vst [vmem:[#allocation17_spill] sm:$0xff] %v5030_v50  ;;  %v2234_v52 = vadd.f32 %v5026_v15, %v2094_v46 }
 0x2ed   : > { %v5028_v4 = vpop.f32.mrf.mxu1  ;;  %v5032_v0 = vpop.f32.mrf.mxu0 }
 0x2ee   : > { %5195 = vst [vmem:[#allocation16_spill] sm:$0xff] %v5028_v4  ;;  %5197 = vst [vmem:[#allocation18_spill] sm:$0xff] %v5032_v0  ;;  %v2084_v0 = vadd.f32 %v3828_v8, %v3784_v48  ;;  %v2229_v4 = vadd.f32 %v2198_v7, %v2069_v40 }
 0x2f0   : > { %v2232_v44 = vadd.f32 %v3872_v56, %v2084_v0  ;;  %v2367_v47 = vadd.f32 %v2336_v57, %v2229_v4  ;;  %v5067_v0 = vld [vmem:[%s5160_s6] ss:$0 sm:$0xff] }
 0x2f2   : > { %v2370_v18 = vadd.f32 %v3916_v16, %v2232_v44 }
 0x301   : > { %v3954_v59 = vpop.f32.mrf.mxu1  ;;  %v3998_v29 = vpop.f32.mrf.mxu0 }
 0x303   : > { %v2464_v45 = vpop.f32.mrf.mxu1  ;;  %v2602_v20 = vpop.f32.mrf.mxu0 }
 0x307   : > { %v3957_v62 = vpop.f32.mrf.mxu1  ;;  %v4001_v26 = vpop.f32.mrf.mxu0 }
 0x309   : > { %v2474_v49 = vpop.f32.mrf.mxu1  ;;  %v2612_v30 = vpop.f32.mrf.mxu0 }
 0x30a   : > { %v2505_v54 = vadd.f32 %v2474_v49, %v2367_v47 }
 0x30c   : > { %v2643_v9 = vadd.f32 %v2612_v30, %v2505_v54 }
 0x30d   : > { %v3960_v22 = vpop.f32.mrf.mxu1  ;;  %v4004_v21 = vpop.f32.mrf.mxu0 }
 0x30e   : > { %v2508_v56 = vadd.f32 %v3960_v22, %v2370_v18 }
 0x30f   : > { %v5034_v28 = vpop.f32.mrf.mxu1  ;;  %v5040_v36 = vpop.f32.mrf.mxu0 }
 0x310   : > { %5198 = vst [vmem:[#allocation14_spill] sm:$0xff] %v5034_v28  ;;  %5201 = vst [vmem:[#allocation20_spill] sm:$0xff] %v5040_v36 }
 0x313   : > { %v5036_v14 = vpop.f32.mrf.mxu1  ;;  %v5042_v11 = vpop.f32.mrf.mxu0 }
 0x314   : > { %5199 = vst [vmem:[#allocation15_spill] sm:$0xff] %v5036_v14  ;;  %5202 = vst [vmem:[#allocation21_spill] sm:$0xff] %v5042_v11  ;;  %v2230_v14 = vadd.f32 %v3869_v53, %v2074_v58  ;;  %v2504_v11 = vadd.f32 %v3954_v59, %v2366_v27  ;;  %v2231_v53 = vadd.f32 %v2208_v13, %v2079_v42 }
 0x315   : > { %v5038_v32 = vpop.f32.mrf.mxu1  ;;  %v5044_v2 = vpop.f32.mrf.mxu0 }
 0x316   : > { %5200 = vst [vmem:[#allocation19_spill] sm:$0xff] %v5038_v32  ;;  %5203 = vst [vmem:[#allocation22_spill] sm:$0xff] %v5044_v2  ;;  %v2365_v32 = vadd.f32 %v2326_v55, %v2227_v39  ;;  %v2368_v28 = vadd.f32 %v3913_v63, %v2230_v14  ;;  %v2642_v50 = vadd.f32 %v3998_v29, %v2504_v11 }
 0x317   : > { %v2089_v63 = vadd.f32 %v5024_v5, %v5020_v1  ;;  %v2369_v51 = vadd.f32 %v2346_v25, %v2231_v53  ;;  %v2646_v5 = vadd.f32 %v4004_v21, %v2508_v56  ;;  %v5206_v25 = vld [vmem:[#allocation14_spill] sm:$0xff]  ;;  %v5208_v14 = vld [vmem:[#allocation20_spill] sm:$0xff] }
 0x318   : > { %v2503_v41 = vadd.f32 %v2464_v45, %v2365_v32  ;;  %v2506_v43 = vadd.f32 %v3957_v62, %v2368_v28  ;;  %v5204_v45 = vld [vmem:[#allocation17_spill] sm:$0xff]  ;;  %v5205_v62 = vld [vmem:[#allocation16_spill] sm:$0xff]  ;;  %v5207_v28 = vld [vmem:[#allocation18_spill] sm:$0xff] }
 0x319   : > { %v2233_v1 = vadd.f32 %v5205_v62, %v2089_v63  ;;  %v2507_v15 = vadd.f32 %v5206_v25, %v2369_v51 }
 0x31a   : > { %v2641_v19 = vadd.f32 %v2602_v20, %v2503_v41  ;;  %v2644_v8 = vadd.f32 %v4001_v26, %v2506_v43 }
 0x31b   : > { %v2371_v30 = vadd.f32 %v5207_v28, %v2233_v1  ;;  %v2645_v32 = vadd.f32 %v5208_v14, %v2507_v15 }
 0x31d   : > { %v5212_v44 = vld [vmem:[#allocation22_spill] sm:$0xff] }
 0x329   : > { %v4042_v33 = vpop.f32.mrf.mxu1  ;;  %v4086_v23 = vpop.f32.mrf.mxu0 }
 0x32a   : > { %v2781_v24 = vadd.f32 %v4042_v33, %v2642_v50  ;;  %v2372_v50 = vadd.f32 %v5204_v45, %v2234_v52  ;;  %v5209_v33 = vld [vmem:[#allocation15_spill] sm:$0xff] }
 0x32b   : > { %v2741_v38 = vpop.f32.mrf.mxu1  ;;  %v2879_v61 = vpop.f32.mrf.mxu0 }
 0x32c   : > { %v2919_v55 = vadd.f32 %v4086_v23, %v2781_v24  ;;  %v2780_v7 = vadd.f32 %v2741_v38, %v2641_v19  ;;  %v2510_v21 = vadd.f32 %v5209_v33, %v2372_v50 }
 0x32d   : > { %v4045_v60 = vpop.f32.mrf.mxu1  ;;  %v4089_v12 = vpop.f32.mrf.mxu0 }
 0x32e   : > { %v2918_v13 = vadd.f32 %v2879_v61, %v2780_v7  ;;  %v2783_v16 = vadd.f32 %v4045_v60, %v2644_v8 }
 0x32f   : > { %v2751_v17 = vpop.f32.mrf.mxu1  ;;  %v2889_v36 = vpop.f32.mrf.mxu0 }
 0x330   : > { %v2921_v49 = vadd.f32 %v4089_v12, %v2783_v16  ;;  %v2782_v20 = vadd.f32 %v2751_v17, %v2643_v9  ;;  %v5210_v17 = vld [vmem:[#allocation21_spill] sm:$0xff]  ;;  %v5211_v12 = vld [vmem:[#allocation19_spill] sm:$0xff] }
 0x331   : > { %v4048_v31 = vpop.f32.mrf.mxu1  ;;  %v2648_v37 = vadd.f32 %v5210_v17, %v2510_v21  ;;  %v2509_v58 = vadd.f32 %v5211_v12, %v2371_v30 }
 0x332   : > { %v4092_v3 = vpop.f32.mrf.mxu0  ;;  %v2785_v38 = vadd.f32 %v4048_v31, %v2646_v5  ;;  %v2920_v60 = vadd.f32 %v2889_v36, %v2782_v20 }
 0x333   : > { %v5046_v35 = vpop.f32.mrf.mxu1  ;;  %v2647_v47 = vadd.f32 %v5212_v44, %v2509_v58 }
 0x334   : > { %v2899_v4 = vpop.f32.mrf.mxu0  ;;  %v2923_v27 = vadd.f32 %v4092_v3, %v2785_v38  ;;  %v2784_v39 = vadd.f32 %v5046_v35, %v2645_v32 }
 0x335   : > { %v5048_v2 = vpop.f32.mrf.mxu1 }
 0x336   : > { %v2922_v19 = vadd.f32 %v2899_v4, %v2784_v39  ;;  %v2787_v43 = vadd.f32 %v5048_v2, %v2648_v37 }
 0x337   : > { %v2771_v48 = vpop.f32.mrf.mxu1  ;;  %v4095_v23 = vpop.f32.mrf.mxu0 }
 0x338   : > { %v2786_v8 = vadd.f32 %v2771_v48, %v2647_v47  ;;  %v2925_v54 = vadd.f32 %v4095_v23, %v2787_v43 }
 0x339   : > { %v2909_v46 = vpop.f32.mrf.mxu0 }
 0x33a   : > { %v2924_v52 = vadd.f32 %v2909_v46, %v2786_v8 }
 0x34b   : > { %v4130_v57 = vpop.f32.mrf.mxu1 }
 0x34c   : > { %v3057_v59 = vadd.f32 %v4130_v57, %v2919_v55 }
 0x34d   : > { %v3017_v29 = vpop.f32.mrf.mxu1 }
 0x34e   : > { %v3072_v22 = vmul.f32 %v5059_v6, %v3057_v59  ;;  %v3056_v26 = vadd.f32 %v3017_v29, %v2918_v13 }
 0x34f   : > { %v4133_v11 = vpop.f32.mrf.mxu1 }
 0x350   : > { %v3087_v61 = vadd.f32 %v5067_v0, %v3072_v22  ;;  %v3071_v10 = vmul.f32 %v5059_v6, %v3056_v26  ;;  %v3059_v34 = vadd.f32 %v4133_v11, %v2921_v49 }
 0x351   : > { %v3027_v40 = vpop.f32.mrf.mxu1 }
 0x352   : > { %v3095_v41 = vmax.f32 %v3087_v61, 0.0  ;;  %v3086_v42 = vadd.f32 %v5067_v0, %v3071_v10  ;;  %v3074_v31 = vmul.f32 %v5059_v6, %v3059_v34  ;;  %v3058_v36 = vadd.f32 %v3027_v40, %v2920_v60 }
 0x353   : > { %v4136_v24 = vpop.f32.mrf.mxu1 }
 0x354   : > { %3103 = vst [vmem:[%s5083_s18 + $0x8] sm:$0xff] %v3095_v41  ;;  %v3094_v35 = vmax.f32 %v3086_v42, 0.0  ;;  %v3089_v3 = vadd.f32 %v5067_v0, %v3074_v31  ;;  %v3073_v18 = vmul.f32 %v5059_v6, %v3058_v36  ;;  %v3061_v53 = vadd.f32 %v4136_v24, %v2923_v27 }
 0x355   : > { %v3037_v55 = vpop.f32.mrf.mxu1 }
 0x356   : > { %3102 = vst [vmem:[%s5083_s18] sm:$0xff] %v3094_v35  ;;  %v3097_v2 = vmax.f32 %v3089_v3, 0.0  ;;  %v3088_v7 = vadd.f32 %v5067_v0, %v3073_v18  ;;  %v3076_v63 = vmul.f32 %v5059_v6, %v3061_v53  ;;  %v3060_v51 = vadd.f32 %v3037_v55, %v2922_v19 }
 0x357   : > { %v4139_v56 = vpop.f32.mrf.mxu1 }
 0x358   : > { %3105 = vst [vmem:[%s5083_s18 + $0x18] sm:$0xff] %v3097_v2  ;;  %v3096_v57 = vmax.f32 %v3088_v7, 0.0  ;;  %v3091_v48 = vadd.f32 %v5067_v0, %v3076_v63  ;;  %v3075_v9 = vmul.f32 %v5059_v6, %v3060_v51  ;;  %v3063_v13 = vadd.f32 %v4139_v56, %v2925_v54 }
 0x359   : > { %v3047_v16 = vpop.f32.mrf.mxu1 }
 0x35a   : > { %3104 = vst [vmem:[%s5083_s18 + $0x10] sm:$0xff] %v3096_v57  ;;  %v3099_v4 = vmax.f32 %v3091_v48, 0.0  ;;  %v3090_v59 = vadd.f32 %v5067_v0, %v3075_v9  ;;  %v3078_v45 = vmul.f32 %v5059_v6, %v3063_v13  ;;  %v3062_v50 = vadd.f32 %v3047_v16, %v2924_v52 }
 0x35c   : > { %3107 = vst [vmem:[%s5083_s18 + $0x28] sm:$0xff] %v3099_v4  ;;  %v3098_v62 = vmax.f32 %v3090_v59, 0.0  ;;  %v3093_v1 = vadd.f32 %v5067_v0, %v3078_v45  ;;  %v3077_v5 = vmul.f32 %v5059_v6, %v3062_v50 }
 0x35e   : > { %3106 = vst [vmem:[%s5083_s18 + $0x20] sm:$0xff] %v3098_v62  ;;  %v3101_v25 = vmax.f32 %v3093_v1, 0.0  ;;  %v3092_v15 = vadd.f32 %v5067_v0, %v3077_v5 }
 0x360   : > { %3109 = vst [vmem:[%s5083_s18 + $0x38] sm:$0xff] %v3101_v25  ;;  %v3100_v29 = vmax.f32 %v3092_v15, 0.0 }
 0x362   : > { %3108 = vst [vmem:[%s5083_s18 + $0x30] sm:$0xff] %v3100_v29 }
 0x363   : > { %4311 = shalt.err (!%p4308_p9)
}
 0x364   : > { %s4312_s23 = scalar_lea.hbm %s5107_s9, 1024  ;;  %s4316_s21 = scalar_lea.hbm %s5161_s7, 2048 }
 0x365   : > { %p4313_p13 = scmp.ne.s32.totalorder %s5107_s9, %s4312_s23  ;;  %p4317_p4 = scmp.lt.s32.totalorder %s5107_s9, %s5161_s7 }
 0x366   : > { %p4318_p8 = scmp.lt.s32.totalorder %s4316_s21, %s4312_s23 }
 0x367   : > { %p4314_p5 = pnand %p4313_p13, %p5213_p10 }
 0x368   : > { %p4319_p7 = por %p4318_p8, %p4317_p4 }
 0x369   : > { %p4315_p0 = pneg %p4314_p5 }
 0x36b   : > { %p4320_p11 = pnand %p4319_p7, %p4315_p0 }
 0x36d   : > { %4323 = shalt.err (!%p4320_p11)
}
 0x36e   : > { %s4378_s19 = smov 128   ;;  %s4379_s30 = smov 8  }
 0x36f   : > { %4152 = dma.vmem_to_hbm [thread:$0]  (%p5213_p10), %s5109_s17, 1024, %s5107_s9, %s3111_s20, %s4378_s19, %s4378_s19, %s4379_s30  }
 0x370 PF: > { %s3139_s28 = sand.u32 1, %s4354_s24   ;;  %p5214_p1 = scmp.ne.s32.totalorder %s5172_s8, 0 }
 0x371   : > { %p5215_p2 = scmp.ge.s32.totalorder %s4366_s27, 2  ;;  %s3140_s29 = scalar_lea.sflag [#allocation6], %s3139_s28 }
 0x373   : > { %p4166_p6 = pnand %p5215_p2, %p5214_p1 }
 0x375   : > { %p4167_p12 = pneg %p4166_p6 }
 0x377   : > { %4349 = dma.done.wait (%p4167_p12), %s3140_s29, 1024  }
 0x378   : > { %4351 = vsyncadd (%p4167_p12), %s3140_s29, 4294966272  ;;  %p21_p3 = scmp.ge.s32.totalorder %s4495_s10, 4   ;;  %s5216_s24 = smov %s4358_s25 }
 0x379   : > { %s5217_s25 = smov %s4362_s26  ;;  %s5218_s26 = smov %s4504_s15 }
 0x37a   : > { %s5219_s27 = smov %s4495_s10  ;;  %23 = sbr.rel (!%p21_p3) target bundleno = 8 (0x8), region = 123 }
 0x37f   :  { %3145 = vsyncpa [#allocation5], 1 }
 0x380   :  { %3147 = vsyncpa [#allocation5 + $0x1], 1 }
 0x381   :  { %3148 = vsyncpa [#allocation8], 1 }
 0x382   :  { %3149 = vsyncpa [#allocation6], 1 }
 0x383   :  { %3151 = vsyncpa [#allocation6 + $0x1], 1 }

</bundles_post_ra>
